<compile_context>
chip_gen: v7x
topology: tpu7x:2x2x1
jax: 0.10.0
libtpu: 0.0.40
codegen_flags: <defaults>
</compile_context>

<pallas_src>
import jax
import jax.numpy as jnp
from jax import lax
from jax.experimental import pallas as pl
from jax.experimental.pallas import tpu as pltpu


# --------------------------------------------------------------------------
# Pallas kernels
# --------------------------------------------------------------------------
def _seq_c13_kernel(x_ref, k0_ref, b0_ref, k1_ref, b1_ref, o_ref, y0p_ref):
    """Fused conv1x1 -> bias-border pad -> 3x3 conv (valid).

    x_ref  : (1, H, W, Cin)   one batch image
    k0_ref : (Cin, Mid)       1x1 weights
    b0_ref : (1, Mid)         1x1 bias
    k1_ref : (9, Mid, Cout)   3x3 weights, tap-major (t = 3*i + j)
    b1_ref : (1, Cout)        3x3 bias
    o_ref  : (1, H, W, Cout)
    y0p_ref: (H+2, W+2, Mid)  VMEM scratch: bias-bordered intermediate
    """
    _, H, W, Cin = x_ref.shape
    Hp, Wp, Mid = y0p_ref.shape
    Cout = o_ref.shape[-1]

    # 1x1 conv: pointwise matmul on the MXU, f32 accumulation.
    x2d = x_ref[0].reshape(H * W, Cin)
    y0 = jnp.dot(x2d, k0_ref[...], preferred_element_type=jnp.float32)
    y0 = y0 + b0_ref[...]

    # Bias-valued 1-pixel border (SeqConv3x3 pad trick), entirely in VMEM.
    y0p_ref[...] = jnp.broadcast_to(b0_ref[...].reshape(1, 1, Mid), (Hp, Wp, Mid))
    y0p_ref[1:H + 1, 1:W + 1, :] = y0.reshape(H, W, Mid)

    # 3x3 valid conv = 9 shifted MXU taps accumulated in f32.
    acc = jnp.broadcast_to(b1_ref[...], (H * W, Cout)).astype(jnp.float32)
    for t in range(9):
        i, j = t // 3, t % 3
        tap = y0p_ref[i:i + H, j:j + W, :].reshape(H * W, Mid)
        acc = acc + jnp.dot(tap, k1_ref[t], preferred_element_type=jnp.float32)
    o_ref[...] = acc.reshape(1, H, W, Cout)


def _seq_edge_kernel(x_ref, k0_ref, b0_ref, w_ref, b1_ref, o_ref, y0p_ref):
    """Fused conv1x1 -> bias-border pad -> depthwise 3x3 (sobel/laplacian).

    w_ref : (9, C) depthwise taps, w[t, c] = scale[c] * mask[i, j], t = 3*i + j.
    """
    _, H, W, Cin = x_ref.shape
    Hp, Wp, C = y0p_ref.shape

    # 1x1 conv on the MXU.
    x2d = x_ref[0].reshape(H * W, Cin)
    y0 = jnp.dot(x2d, k0_ref[...], preferred_element_type=jnp.float32)
    y0 = y0 + b0_ref[...]

    # Bias-valued border in VMEM scratch.
    y0p_ref[...] = jnp.broadcast_to(b0_ref[...].reshape(1, 1, C), (Hp, Wp, C))
    y0p_ref[1:H + 1, 1:W + 1, :] = y0.reshape(H, W, C)

    # Depthwise 3x3 = 9 shifted VPU multiply-accumulates.
    acc = jnp.broadcast_to(b1_ref[...].reshape(1, 1, C), (H, W, C)).astype(jnp.float32)
    for t in range(9):
        i, j = t // 3, t % 3
        acc = acc + y0p_ref[i:i + H, j:j + W, :] * w_ref[t, :]
    o_ref[...] = acc.reshape(1, H, W, C)


_COMPILER_PARAMS = pltpu.CompilerParams(
    dimension_semantics=("parallel",),       # batch grid axis -> both TCs on v7x
    vmem_limit_bytes=32 * 1024 * 1024,       # safe on v5e/v6e/v7x (64 MiB phys min)
)


# --------------------------------------------------------------------------
# pallas_call wrappers
# --------------------------------------------------------------------------
def _seqconv_c13(x_nhwc, k0, b0, k1, b1):
    """conv1x1-conv3x3 branch.  x: NHWC, k0/k1: OIHW."""
    N, H, W, Cin = x_nhwc.shape
    Mid = k0.shape[0]
    Cout = k1.shape[0]
    k0m = jnp.transpose(k0.reshape(Mid, Cin), (1, 0)).astype(jnp.float32)        # (Cin, Mid)
    k1m = jnp.transpose(k1, (2, 3, 1, 0)).reshape(9, Mid, Cout).astype(jnp.float32)
    b0r = b0.reshape(1, Mid).astype(jnp.float32)
    b1r = b1.reshape(1, Cout).astype(jnp.float32)
    return pl.pallas_call(
        _seq_c13_kernel,
        out_shape=jax.ShapeDtypeStruct((N, H, W, Cout), jnp.float32),
        grid_spec=pltpu.PrefetchScalarGridSpec(
            num_scalar_prefetch=0,
            grid=(N,),
            in_specs=[
                pl.BlockSpec((1, H, W, Cin), lambda n: (n, 0, 0, 0)),
                pl.BlockSpec((Cin, Mid), lambda n: (0, 0)),
                pl.BlockSpec((1, Mid), lambda n: (0, 0)),
                pl.BlockSpec((9, Mid, Cout), lambda n: (0, 0, 0)),
                pl.BlockSpec((1, Cout), lambda n: (0, 0)),
            ],
            out_specs=pl.BlockSpec((1, H, W, Cout), lambda n: (n, 0, 0, 0)),
            scratch_shapes=[pltpu.VMEM((H + 2, W + 2, Mid), jnp.float32)],
        ),
        compiler_params=_COMPILER_PARAMS,
    )(x_nhwc.astype(jnp.float32), k0m, b0r, k1m, b1r)


def _seqconv_edge(x_nhwc, k0, b0, scale, bias, mask2d):
    """conv1x1-{sobelx,sobely,laplacian} branch."""
    N, H, W, Cin = x_nhwc.shape
    C = k0.shape[0]
    k0m = jnp.transpose(k0.reshape(C, Cin), (1, 0)).astype(jnp.float32)          # (Cin, C)
    b0r = b0.reshape(1, C).astype(jnp.float32)
    wdw = (mask2d.reshape(9, 1) * scale.reshape(1, C)).astype(jnp.float32)       # (9, C)
    b1r = bias.reshape(1, C).astype(jnp.float32)
    return pl.pallas_call(
        _seq_edge_kernel,
        out_shape=jax.ShapeDtypeStruct((N, H, W, C), jnp.float32),
        grid_spec=pltpu.PrefetchScalarGridSpec(
            num_scalar_prefetch=0,
            grid=(N,),
            in_specs=[
                pl.BlockSpec((1, H, W, Cin), lambda n: (n, 0, 0, 0)),
                pl.BlockSpec((Cin, C), lambda n: (0, 0)),
                pl.BlockSpec((1, C), lambda n: (0, 0)),
                pl.BlockSpec((9, C), lambda n: (0, 0)),
                pl.BlockSpec((1, C), lambda n: (0, 0)),
            ],
            out_specs=pl.BlockSpec((1, H, W, C), lambda n: (n, 0, 0, 0)),
            scratch_shapes=[pltpu.VMEM((H + 2, W + 2, C), jnp.float32)],
        ),
        compiler_params=_COMPILER_PARAMS,
    )(x_nhwc.astype(jnp.float32), k0m, b0r, wdw, b1r)


def seqconv3x3_forward(params, x_nchw, *, seq_type):
    """PyTorch-equivalent SeqConv3x3.forward: NCHW in -> NCHW out."""
    x = jnp.transpose(x_nchw, (0, 2, 3, 1)).astype(jnp.float32)   # NCHW -> NHWC
    if seq_type == "conv1x1-conv3x3":
        y = _seqconv_c13(x, params["k0"], params["b0"], params["k1"], params["b1"])
    else:
        y = _seqconv_edge(x, params["k0"], params["b0"], params["scale"],
                          params["bias"], params["mask2d"])
    return jnp.transpose(y, (0, 3, 1, 2))                         # NHWC -> NCHW


# --------------------------------------------------------------------------
# Parameter init (deterministic, mimics the PyTorch module)
# --------------------------------------------------------------------------
_SOBEL_X = jnp.array([[1., 0., -1.], [2., 0., -2.], [1., 0., -1.]], jnp.float32)
_SOBEL_Y = jnp.array([[1., 2., 1.], [0., 0., 0.], [-1., -2., -1.]], jnp.float32)
_LAPL = jnp.array([[0., 1., 0.], [1., -4., 1.], [0., 1., 0.]], jnp.float32)
_MASKS = {"conv1x1-sobelx": _SOBEL_X, "conv1x1-sobely": _SOBEL_Y,
          "conv1x1-laplacian": _LAPL}


def _init_conv(key, out_ch, in_ch, k):
    k1, k2 = jax.random.split(key)
    bound = 1.0 / float(in_ch * k * k) ** 0.5
    w = jax.random.uniform(k1, (out_ch, in_ch, k, k), jnp.float32, -bound, bound)
    b = jax.random.uniform(k2, (out_ch,), jnp.float32, -bound, bound)
    return w, b


def init_seqconv3x3(key, seq_type, inp_planes, out_planes, depth_multiplier):
    if seq_type == "conv1x1-conv3x3":
        mid = int(out_planes * depth_multiplier)
        ka, kb = jax.random.split(key)
        k0, b0 = _init_conv(ka, mid, inp_planes, 1)
        k1, b1 = _init_conv(kb, out_planes, mid, 3)
        return {"k0": k0, "b0": b0, "k1": k1, "b1": b1}
    ka, kb, kc = jax.random.split(key, 3)
    k0, b0 = _init_conv(ka, out_planes, inp_planes, 1)
    scale = jax.random.normal(kb, (out_planes,), jnp.float32) * 0.001
    bias = jax.random.normal(kc, (out_planes,), jnp.float32) * 0.001
    return {"k0": k0, "b0": b0, "scale": scale, "bias": bias,
            "mask2d": _MASKS[seq_type]}


# --------------------------------------------------------------------------
# Pure-JAX reference (for correctness check only)
# --------------------------------------------------------------------------
def _reference_forward(params, x_nchw, seq_type):
    x = jnp.transpose(x_nchw, (0, 2, 3, 1)).astype(jnp.float32)
    k0, b0 = params["k0"], params["b0"]
    y0 = lax.conv_general_dilated(
        x, jnp.transpose(k0, (2, 3, 1, 0)), (1, 1), "VALID",
        dimension_numbers=("NHWC", "HWIO", "NHWC"),
        precision=lax.Precision.HIGHEST) + b0.reshape(1, 1, 1, -1)
    y0 = jnp.pad(y0, ((0, 0), (1, 1), (1, 1), (0, 0)))
    bb = b0.reshape(1, 1, 1, -1)
    y0 = y0.at[:, 0:1, :, :].set(bb)
    y0 = y0.at[:, -1:, :, :].set(bb)
    y0 = y0.at[:, :, 0:1, :].set(bb)
    y0 = y0.at[:, :, -1:, :].set(bb)
    if seq_type == "conv1x1-conv3x3":
        w = jnp.transpose(params["k1"], (2, 3, 1, 0))            # HWIO
        y1 = lax.conv_general_dilated(
            y0, w, (1, 1), "VALID",
            dimension_numbers=("NHWC", "HWIO", "NHWC"),
            precision=lax.Precision.HIGHEST) + params["b1"].reshape(1, 1, 1, -1)
    else:
        C = params["k0"].shape[0]
        w = params["mask2d"][:, :, None, None] * params["scale"].reshape(1, 1, 1, C)
        y1 = lax.conv_general_dilated(
            y0, w, (1, 1), "VALID",
            dimension_numbers=("NHWC", "HWIO", "NHWC"),
            feature_group_count=C,
            precision=lax.Precision.HIGHEST) + params["bias"].reshape(1, 1, 1, -1)
    return jnp.transpose(y1, (0, 3, 1, 2))


# --------------------------------------------------------------------------
if __name__ == "__main__":
    key = jax.random.PRNGKey(0)
    xkey, pkey = jax.random.split(key)

    N, Cin, H, W = 2, 4, 16, 16
    out_planes, depth_multiplier = 16, 2.0
    x = jax.random.normal(xkey, (N, Cin, H, W), jnp.float32)

    seq_types = ("conv1x1-conv3x3", "conv1x1-sobelx",
                 "conv1x1-sobely", "conv1x1-laplacian")
    pkeys = jax.random.split(pkey, len(seq_types))

    fwd = jax.jit(seqconv3x3_forward, static_argnames=("seq_type",))

    for st, pk in zip(seq_types, pkeys):
        params = init_seqconv3x3(pk, st, Cin, out_planes, depth_multiplier)
        y = fwd(params, x, seq_type=st)
        jax.block_until_ready(y)
        assert y.shape == (N, out_planes, H, W), (st, y.shape)
        assert bool(jnp.all(jnp.isfinite(y))), st
        y_ref = _reference_forward(params, x, st)
        err = float(jnp.max(jnp.abs(y - y_ref)))
        assert err < 2e-3, (st, err)

    print("KERNEL_OK")
</pallas_src>

<mosaic_0001>
module attributes {stable_mosaic.version = 11 : i64} {
  func.func @_seq_c13_kernel(%arg0: i32, %arg1: memref<1x16x16x4xf32, #tpu.memory_space<vmem>>, %arg2: memref<4x32xf32, #tpu.memory_space<vmem>>, %arg3: memref<1x32xf32, #tpu.memory_space<vmem>>, %arg4: memref<9x32x16xf32, #tpu.memory_space<vmem>>, %arg5: memref<1x16xf32, #tpu.memory_space<vmem>>, %arg6: memref<1x16x16x16xf32, #tpu.memory_space<vmem>>, %arg7: memref<18x18x32xf32, #tpu.memory_space<vmem>>) attributes {dimension_semantics = [#tpu.dimension_semantics<parallel>], iteration_bounds = array<i64: 2>, scalar_prefetch = 0 : i64, scratch_operands = 1 : i64, tpu.core_type = #tpu.core_type<tc>, window_params = [{transform_indices = @transform_0, window_bounds = array<i64: 1, 16, 16, 4>}, {pipeline_mode = #tpu.pipeline_mode<synchronous>, transform_indices = @transform_1, window_bounds = array<i64: 4, 32>}, {pipeline_mode = #tpu.pipeline_mode<synchronous>, transform_indices = @transform_2, window_bounds = array<i64: 1, 32>}, {pipeline_mode = #tpu.pipeline_mode<synchronous>, transform_indices = @transform_3, window_bounds = array<i64: 9, 32, 16>}, {pipeline_mode = #tpu.pipeline_mode<synchronous>, transform_indices = @transform_4, window_bounds = array<i64: 1, 16>}, {transform_indices = @transform_5, window_bounds = array<i64: 1, 16, 16, 16>}]} {
    %c0 = arith.constant 0 : index
    %c0_0 = arith.constant 0 : index
    %c0_1 = arith.constant 0 : index
    %c0_2 = arith.constant 0 : index
    %0 = vector.load %arg1[%c0, %c0_0, %c0_1, %c0_2] : memref<1x16x16x4xf32, #tpu.memory_space<vmem>>, vector<1x16x16x4xf32>
    %1 = vector.shape_cast %0 : vector<1x16x16x4xf32> to vector<16x16x4xf32>
    %2 = vector.shape_cast %1 : vector<16x16x4xf32> to vector<256x4xf32>
    %c0_3 = arith.constant 0 : index
    %c0_4 = arith.constant 0 : index
    %3 = vector.load %arg2[%c0_3, %c0_4] : memref<4x32xf32, #tpu.memory_space<vmem>>, vector<4x32xf32>
    %cst = arith.constant dense<0.000000e+00> : vector<256x32xf32>
    %4 = tpu.matmul %2, %3, %cst {dimension_numbers = #tpu.dot_dimension_numbers<[1], [0], [0], [1], [0, 0, 1, 1], [], []>} : vector<256x4xf32>, vector<4x32xf32>, vector<256x32xf32> -> vector<256x32xf32>
    %c0_5 = arith.constant 0 : index
    %c0_6 = arith.constant 0 : index
    %5 = vector.load %arg3[%c0_5, %c0_6] : memref<1x32xf32, #tpu.memory_space<vmem>>, vector<1x32xf32>
    %6 = vector.broadcast %5 : vector<1x32xf32> to vector<256x32xf32>
    %7 = arith.addf %4, %6 : vector<256x32xf32>
    %c0_7 = arith.constant 0 : index
    %c0_8 = arith.constant 0 : index
    %8 = vector.load %arg3[%c0_7, %c0_8] : memref<1x32xf32, #tpu.memory_space<vmem>>, vector<1x32xf32>
    %9 = vector.shape_cast %8 : vector<1x32xf32> to vector<1x1x32xf32>
    %10 = vector.shape_cast %9 : vector<1x1x32xf32> to vector<1x1x32xf32>
    %11 = vector.broadcast %10 : vector<1x1x32xf32> to vector<18x18x32xf32>
    %c0_9 = arith.constant 0 : index
    %c0_10 = arith.constant 0 : index
    %c0_11 = arith.constant 0 : index
    %12 = vector.load %arg7[%c0_9, %c0_10, %c0_11] : memref<18x18x32xf32, #tpu.memory_space<vmem>>, vector<18x18x32xf32>
    tpu.vector_store %arg7[%c0_9, %c0_10, %c0_11], %11 {strides = array<i32>} : memref<18x18x32xf32, #tpu.memory_space<vmem>>, vector<18x18x32xf32>,
    %13 = vector.shape_cast %7 : vector<256x32xf32> to vector<16x16x32xf32>
    %c1 = arith.constant 1 : index
    %c1_12 = arith.constant 1 : index
    %c0_13 = arith.constant 0 : index
    %14 = vector.load %arg7[%c1, %c1_12, %c0_13] : memref<18x18x32xf32, #tpu.memory_space<vmem>>, vector<16x16x32xf32>
    tpu.vector_store %arg7[%c1, %c1_12, %c0_13], %13 {strides = array<i32>} : memref<18x18x32xf32, #tpu.memory_space<vmem>>, vector<16x16x32xf32>,
    %c0_14 = arith.constant 0 : index
    %c0_15 = arith.constant 0 : index
    %15 = vector.load %arg5[%c0_14, %c0_15] : memref<1x16xf32, #tpu.memory_space<vmem>>, vector<1x16xf32>
    %16 = vector.shape_cast %15 : vector<1x16xf32> to vector<1x16xf32>
    %17 = vector.broadcast %16 : vector<1x16xf32> to vector<256x16xf32>
    %c0_16 = arith.constant 0 : index
    %c0_17 = arith.constant 0 : index
    %c0_18 = arith.constant 0 : index
    %18 = vector.load %arg7[%c0_16, %c0_17, %c0_18] : memref<18x18x32xf32, #tpu.memory_space<vmem>>, vector<16x16x32xf32>
    %19 = vector.shape_cast %18 : vector<16x16x32xf32> to vector<256x32xf32>
    %c0_19 = arith.constant 0 : index
    %c0_20 = arith.constant 0 : index
    %c0_21 = arith.constant 0 : index
    %20 = vector.load %arg4[%c0_19, %c0_20, %c0_21] : memref<9x32x16xf32, #tpu.memory_space<vmem>>, vector<1x32x16xf32>
    %21 = vector.shape_cast %20 : vector<1x32x16xf32> to vector<32x16xf32>
    %cst_22 = arith.constant dense<0.000000e+00> : vector<256x16xf32>
    %22 = tpu.matmul %19, %21, %cst_22 {dimension_numbers = #tpu.dot_dimension_numbers<[1], [0], [0], [1], [0, 0, 1, 1], [], []>} : vector<256x32xf32>, vector<32x16xf32>, vector<256x16xf32> -> vector<256x16xf32>
    %23 = arith.addf %17, %22 : vector<256x16xf32>
    %c0_23 = arith.constant 0 : index
    %c1_24 = arith.constant 1 : index
    %c0_25 = arith.constant 0 : index
    %24 = vector.load %arg7[%c0_23, %c1_24, %c0_25] : memref<18x18x32xf32, #tpu.memory_space<vmem>>, vector<16x16x32xf32>
    %25 = vector.shape_cast %24 : vector<16x16x32xf32> to vector<256x32xf32>
    %c1_26 = arith.constant 1 : index
    %c0_27 = arith.constant 0 : index
    %c0_28 = arith.constant 0 : index
    %26 = vector.load %arg4[%c1_26, %c0_27, %c0_28] : memref<9x32x16xf32, #tpu.memory_space<vmem>>, vector<1x32x16xf32>
    %27 = vector.shape_cast %26 : vector<1x32x16xf32> to vector<32x16xf32>
    %cst_29 = arith.constant dense<0.000000e+00> : vector<256x16xf32>
    %28 = tpu.matmul %25, %27, %cst_29 {dimension_numbers = #tpu.dot_dimension_numbers<[1], [0], [0], [1], [0, 0, 1, 1], [], []>} : vector<256x32xf32>, vector<32x16xf32>, vector<256x16xf32> -> vector<256x16xf32>
    %29 = arith.addf %23, %28 : vector<256x16xf32>
    %c0_30 = arith.constant 0 : index
    %c2 = arith.constant 2 : index
    %c0_31 = arith.constant 0 : index
    %30 = vector.load %arg7[%c0_30, %c2, %c0_31] : memref<18x18x32xf32, #tpu.memory_space<vmem>>, vector<16x16x32xf32>
    %31 = vector.shape_cast %30 : vector<16x16x32xf32> to vector<256x32xf32>
    %c2_32 = arith.constant 2 : index
    %c0_33 = arith.constant 0 : index
    %c0_34 = arith.constant 0 : index
    %32 = vector.load %arg4[%c2_32, %c0_33, %c0_34] : memref<9x32x16xf32, #tpu.memory_space<vmem>>, vector<1x32x16xf32>
    %33 = vector.shape_cast %32 : vector<1x32x16xf32> to vector<32x16xf32>
    %cst_35 = arith.constant dense<0.000000e+00> : vector<256x16xf32>
    %34 = tpu.matmul %31, %33, %cst_35 {dimension_numbers = #tpu.dot_dimension_numbers<[1], [0], [0], [1], [0, 0, 1, 1], [], []>} : vector<256x32xf32>, vector<32x16xf32>, vector<256x16xf32> -> vector<256x16xf32>
    %35 = arith.addf %29, %34 : vector<256x16xf32>
    %c1_36 = arith.constant 1 : index
    %c0_37 = arith.constant 0 : index
    %c0_38 = arith.constant 0 : index
    %36 = vector.load %arg7[%c1_36, %c0_37, %c0_38] : memref<18x18x32xf32, #tpu.memory_space<vmem>>, vector<16x16x32xf32>
    %37 = vector.shape_cast %36 : vector<16x16x32xf32> to vector<256x32xf32>
    %c3 = arith.constant 3 : index
    %c0_39 = arith.constant 0 : index
    %c0_40 = arith.constant 0 : index
    %38 = vector.load %arg4[%c3, %c0_39, %c0_40] : memref<9x32x16xf32, #tpu.memory_space<vmem>>, vector<1x32x16xf32>
    %39 = vector.shape_cast %38 : vector<1x32x16xf32> to vector<32x16xf32>
    %cst_41 = arith.constant dense<0.000000e+00> : vector<256x16xf32>
    %40 = tpu.matmul %37, %39, %cst_41 {dimension_numbers = #tpu.dot_dimension_numbers<[1], [0], [0], [1], [0, 0, 1, 1], [], []>} : vector<256x32xf32>, vector<32x16xf32>, vector<256x16xf32> -> vector<256x16xf32>
    %41 = arith.addf %35, %40 : vector<256x16xf32>
    %c1_42 = arith.constant 1 : index
    %c1_43 = arith.constant 1 : index
    %c0_44 = arith.constant 0 : index
    %42 = vector.load %arg7[%c1_42, %c1_43, %c0_44] : memref<18x18x32xf32, #tpu.memory_space<vmem>>, vector<16x16x32xf32>
    %43 = vector.shape_cast %42 : vector<16x16x32xf32> to vector<256x32xf32>
    %c4 = arith.constant 4 : index
    %c0_45 = arith.constant 0 : index
    %c0_46 = arith.constant 0 : index
    %44 = vector.load %arg4[%c4, %c0_45, %c0_46] : memref<9x32x16xf32, #tpu.memory_space<vmem>>, vector<1x32x16xf32>
    %45 = vector.shape_cast %44 : vector<1x32x16xf32> to vector<32x16xf32>
    %cst_47 = arith.constant dense<0.000000e+00> : vector<256x16xf32>
    %46 = tpu.matmul %43, %45, %cst_47 {dimension_numbers = #tpu.dot_dimension_numbers<[1], [0], [0], [1], [0, 0, 1, 1], [], []>} : vector<256x32xf32>, vector<32x16xf32>, vector<256x16xf32> -> vector<256x16xf32>
    %47 = arith.addf %41, %46 : vector<256x16xf32>
    %c1_48 = arith.constant 1 : index
    %c2_49 = arith.constant 2 : index
    %c0_50 = arith.constant 0 : index
    %48 = vector.load %arg7[%c1_48, %c2_49, %c0_50] : memref<18x18x32xf32, #tpu.memory_space<vmem>>, vector<16x16x32xf32>
    %49 = vector.shape_cast %48 : vector<16x16x32xf32> to vector<256x32xf32>
    %c5 = arith.constant 5 : index
    %c0_51 = arith.constant 0 : index
    %c0_52 = arith.constant 0 : index
    %50 = vector.load %arg4[%c5, %c0_51, %c0_52] : memref<9x32x16xf32, #tpu.memory_space<vmem>>, vector<1x32x16xf32>
    %51 = vector.shape_cast %50 : vector<1x32x16xf32> to vector<32x16xf32>
    %cst_53 = arith.constant dense<0.000000e+00> : vector<256x16xf32>
    %52 = tpu.matmul %49, %51, %cst_53 {dimension_numbers = #tpu.dot_dimension_numbers<[1], [0], [0], [1], [0, 0, 1, 1], [], []>} : vector<256x32xf32>, vector<32x16xf32>, vector<256x16xf32> -> vector<256x16xf32>
    %53 = arith.addf %47, %52 : vector<256x16xf32>
    %c2_54 = arith.constant 2 : index
    %c0_55 = arith.constant 0 : index
    %c0_56 = arith.constant 0 : index
    %54 = vector.load %arg7[%c2_54, %c0_55, %c0_56] : memref<18x18x32xf32, #tpu.memory_space<vmem>>, vector<16x16x32xf32>
    %55 = vector.shape_cast %54 : vector<16x16x32xf32> to vector<256x32xf32>
    %c6 = arith.constant 6 : index
    %c0_57 = arith.constant 0 : index
    %c0_58 = arith.constant 0 : index
    %56 = vector.load %arg4[%c6, %c0_57, %c0_58] : memref<9x32x16xf32, #tpu.memory_space<vmem>>, vector<1x32x16xf32>
    %57 = vector.shape_cast %56 : vector<1x32x16xf32> to vector<32x16xf32>
    %cst_59 = arith.constant dense<0.000000e+00> : vector<256x16xf32>
    %58 = tpu.matmul %55, %57, %cst_59 {dimension_numbers = #tpu.dot_dimension_numbers<[1], [0], [0], [1], [0, 0, 1, 1], [], []>} : vector<256x32xf32>, vector<32x16xf32>, vector<256x16xf32> -> vector<256x16xf32>
    %59 = arith.addf %53, %58 : vector<256x16xf32>
    %c2_60 = arith.constant 2 : index
    %c1_61 = arith.constant 1 : index
    %c0_62 = arith.constant 0 : index
    %60 = vector.load %arg7[%c2_60, %c1_61, %c0_62] : memref<18x18x32xf32, #tpu.memory_space<vmem>>, vector<16x16x32xf32>
    %61 = vector.shape_cast %60 : vector<16x16x32xf32> to vector<256x32xf32>
    %c7 = arith.constant 7 : index
    %c0_63 = arith.constant 0 : index
    %c0_64 = arith.constant 0 : index
    %62 = vector.load %arg4[%c7, %c0_63, %c0_64] : memref<9x32x16xf32, #tpu.memory_space<vmem>>, vector<1x32x16xf32>
    %63 = vector.shape_cast %62 : vector<1x32x16xf32> to vector<32x16xf32>
    %cst_65 = arith.constant dense<0.000000e+00> : vector<256x16xf32>
    %64 = tpu.matmul %61, %63, %cst_65 {dimension_numbers = #tpu.dot_dimension_numbers<[1], [0], [0], [1], [0, 0, 1, 1], [], []>} : vector<256x32xf32>, vector<32x16xf32>, vector<256x16xf32> -> vector<256x16xf32>
    %65 = arith.addf %59, %64 : vector<256x16xf32>
    %c2_66 = arith.constant 2 : index
    %c2_67 = arith.constant 2 : index
    %c0_68 = arith.constant 0 : index
    %66 = vector.load %arg7[%c2_66, %c2_67, %c0_68] : memref<18x18x32xf32, #tpu.memory_space<vmem>>, vector<16x16x32xf32>
    %67 = vector.shape_cast %66 : vector<16x16x32xf32> to vector<256x32xf32>
    %c8 = arith.constant 8 : index
    %c0_69 = arith.constant 0 : index
    %c0_70 = arith.constant 0 : index
    %68 = vector.load %arg4[%c8, %c0_69, %c0_70] : memref<9x32x16xf32, #tpu.memory_space<vmem>>, vector<1x32x16xf32>
    %69 = vector.shape_cast %68 : vector<1x32x16xf32> to vector<32x16xf32>
    %cst_71 = arith.constant dense<0.000000e+00> : vector<256x16xf32>
    %70 = tpu.matmul %67, %69, %cst_71 {dimension_numbers = #tpu.dot_dimension_numbers<[1], [0], [0], [1], [0, 0, 1, 1], [], []>} : vector<256x32xf32>, vector<32x16xf32>, vector<256x16xf32> -> vector<256x16xf32>
    %71 = arith.addf %65, %70 : vector<256x16xf32>
    %72 = vector.shape_cast %71 : vector<256x16xf32> to vector<1x16x16x16xf32>
    %c0_72 = arith.constant 0 : index
    %c0_73 = arith.constant 0 : index
    %c0_74 = arith.constant 0 : index
    %c0_75 = arith.constant 0 : index
    %73 = vector.load %arg6[%c0_72, %c0_73, %c0_74, %c0_75] : memref<1x16x16x16xf32, #tpu.memory_space<vmem>>, vector<1x16x16x16xf32>
    tpu.vector_store %arg6[%c0_72, %c0_73, %c0_74, %c0_75], %72 {strides = array<i32>} : memref<1x16x16x16xf32, #tpu.memory_space<vmem>>, vector<1x16x16x16xf32>,
    return
  }
  func.func @transform_0(%arg0: i32) -> (i32, i32, i32, i32) {
    %c0_i32 = arith.constant 0 : i32
    %c0_i32_0 = arith.constant 0 : i32
    %c0_i32_1 = arith.constant 0 : i32
    %c0_i32_2 = arith.constant 0 : i32
    return %arg0, %c0_i32, %c0_i32_0, %c0_i32_1 : i32, i32, i32, i32
  }
  func.func @transform_1(%arg0: i32) -> (i32, i32) {
    %c0_i32 = arith.constant 0 : i32
    %c0_i32_0 = arith.constant 0 : i32
    %c0_i32_1 = arith.constant 0 : i32
    return %c0_i32, %c0_i32_0 : i32, i32
  }
  func.func @transform_2(%arg0: i32) -> (i32, i32) {
    %c0_i32 = arith.constant 0 : i32
    %c0_i32_0 = arith.constant 0 : i32
    %c0_i32_1 = arith.constant 0 : i32
    return %c0_i32, %c0_i32_0 : i32, i32
  }
  func.func @transform_3(%arg0: i32) -> (i32, i32, i32) {
    %c0_i32 = arith.constant 0 : i32
    %c0_i32_0 = arith.constant 0 : i32
    %c0_i32_1 = arith.constant 0 : i32
    %c0_i32_2 = arith.constant 0 : i32
    return %c0_i32, %c0_i32_0, %c0_i32_1 : i32, i32, i32
  }
  func.func @transform_4(%arg0: i32) -> (i32, i32) {
    %c0_i32 = arith.constant 0 : i32
    %c0_i32_0 = arith.constant 0 : i32
    %c0_i32_1 = arith.constant 0 : i32
    return %c0_i32, %c0_i32_0 : i32, i32
  }
  func.func @transform_5(%arg0: i32) -> (i32, i32, i32, i32) {
    %c0_i32 = arith.constant 0 : i32
    %c0_i32_0 = arith.constant 0 : i32
    %c0_i32_1 = arith.constant 0 : i32
    %c0_i32_2 = arith.constant 0 : i32
    return %arg0, %c0_i32, %c0_i32_0, %c0_i32_1 : i32, i32, i32, i32
  }
}

</mosaic_0001>

<bundles_post_ra>
// kernel: seqconv3x3_forward.1
= control target key start
LH: loop header
LB: loop body
LE: loop exit
PB: predicated region body
PF: predicated region fallthrough
CT: control target
= control target key end

     0   :  { %s5970_s18 = smov 0   ;;  %s7293_s0 = inlined_call_operand.vmem [shape: f32[2,16,16,4], index: 0, kind: input, shape index: {}]   ;;  %s7294_s1 = inlined_call_operand.vmem [shape: f32[4,32], index: 1, kind: input, shape index: {}]   ;;  %s7295_s2 = inlined_call_operand.vmem [shape: f32[1,32], index: 2, kind: input, shape index: {}]   ;;  %s7296_s3 = inlined_call_operand.vmem [shape: f32[9,32,16], index: 3, kind: input, shape index: {}]   ;;  %s7297_s4 = inlined_call_operand.vmem [shape: f32[1,16], index: 4, kind: input, shape index: {}]   ;;  %s7298_s5 = inlined_call_operand.vmem [shape: f32[2,16,16,16], index: 5, kind: output, shape index: {}]  }
   0x1 LB: > { %s4285_s19 = sadd.s32 4294967295, %s5938_s18   ;;  %p4289_p0 = scmp.ge.s32.totalorder %s5938_s18, 1  ;;  %s5938_s18 = sphi %s5970_s18, %s15_s18  }
   0x2   : > { %p187_p1 = scmp.lt.s32.totalorder %s5938_s18, 3 }
   0x4   : > { %p188_p2 = pnand %p4289_p0, %p187_p1 }
   0x6   : > { %191 = sbr.rel (%p188_p2) target bundleno = 778 (0x30a), region = 40 }
   0xd   : > { %v257_v0 = vld [vmem:[%s7294_s1] sm:$0xf]  ;;  %vm362_vm0 = vcmask 1043456   ;;  %p215_p3 = scmp.lt.s32.totalorder %s4285_s19, 1  ;;  %vm265_vm1 = vcmask 31744   ;;  %v720_v34 = vld [vmem:[%s7296_s3 + $0x8] sm:$0xff] }
   0xe   : > { %5010 = vmatprep.subr.msk.mxu0 %vm362_vm0, %v257_v0  ;;  %v719_v33 = vld [vmem:[%s7296_s3] sm:$0xff]  ;;  %vm591_vm2 = vcmask 261120   ;;  %vm594_vm3 = vcmask 254976   ;;  %v4470_v38 = vld [vmem:[%s7296_s3 + $0x88] sm:$0xff]  ;;  %v721_v39 = vld [vmem:[%s7296_s3 + $0x10] sm:$0xff]  ;;  %vm4197_vm4 = vcmask 130048  }
   0xf   : > { %5011 = vmatpush3.msk.msra.mxu0 %vm362_vm0, %v257_v0  ;;  %s7429_s19 = smov (!%p215_p3, %s4285_s19), 1  ;;  %v6064_v35 = vld [vmem:[%s7295_s2] ss:$0 sm:$0xff]  ;;  %v5564_v36 = vpack.c.bf16 %v720_v34, %v719_v33  ;;  %v722_v41 = vld [vmem:[%s7296_s3 + $0x18] sm:$0xff]  ;;  %v4471_v43 = vld [vmem:[%s7296_s3 + $0x90] sm:$0xff] }
  0x10   : > { %s4651_s22 = sshll.u32 %s7429_s19, 8  ;;  %597 = vst.msk [vmem:[#allocation2 + $0x20] sm:$0xff] %vm591_vm2, %v6064_v35  ;;  %592 = vst.msk [vmem:[#allocation2] sm:$0xff] %vm591_vm2, %v6064_v35  ;;  %v4469_v37 = vld [vmem:[%s7296_s3 + $0x80] sm:$0xff]  ;;  %v5568_v42 = vpack.c.bf16 %v722_v41, %v721_v39  ;;  %v4472_v44 = vld [vmem:[%s7296_s3 + $0x98] sm:$0xff] }
  0x11   : > { %s5989_s25 = scalar_lea.vmem %s7293_s0, %s4651_s22  ;;  %593 = vst.msk [vmem:[#allocation2 + $0x8] sm:$0xff] %vm591_vm2, %v6064_v35  ;;  %596 = vst.msk [vmem:[#allocation2 + $0x18] sm:$0xff] %vm591_vm2, %v6064_v35  ;;  %5565 = vmatprep.subr.bf16.mxu0 %v5564_v36  ;;  %v5596_v40 = vpack.c.bf16 %v4470_v38, %v4469_v37  ;;  %v5600_v46 = vpack.c.bf16 %v4472_v44, %v4471_v43  ;;  %v4505_v48 = vld [vmem:[%s7296_s3 + $0xa0] sm:$0xff]  ;;  %v4506_v49 = vld [vmem:[%s7296_s3 + $0xa8] sm:$0xff]  ;;  %s7171_s13 = scalar_lea.vmem %s7298_s5, %s4651_s22 }
  0x12   : > { %v225_v1 = vld [vmem:[%s5989_s25] sm:$0xff]  ;;  %v226_v2 = vld [vmem:[%s5989_s25 + $0x8] sm:$0xff]  ;;  %v227_v3 = vld [vmem:[%s5989_s25 + $0x10] sm:$0xff]  ;;  %599 = vst.msk [vmem:[#allocation2 + $0x30] sm:$0xff] %vm591_vm2, %v6064_v35  ;;  %v5604_v50 = vpack.c.bf16 %v4506_v49, %v4505_v48 }
  0x13   : > { %5012 = vmatprep.mubr.msk.f32.mxu0 %vm265_vm1, %v225_v1  ;;  %v228_v4 = vld [vmem:[%s5989_s25 + $0x18] sm:$0xff]  ;;  %v229_v5 = vld [vmem:[%s5989_s25 + $0x20] sm:$0xff]  ;;  %v230_v6 = vld [vmem:[%s5989_s25 + $0x28] sm:$0xff]  ;;  %600 = vst.msk [vmem:[#allocation2 + $0x38] sm:$0xff] %vm591_vm2, %v6064_v35  ;;  %5597 = vmatprep.subr.bf16.mxu1 %v5596_v40 }
  0x14   : > { %5013 = vmatmul.mubr.msk.f32.vlgmr.msra.gmra.mrb[0].mxu0 %vm265_vm1, %v226_v2  ;;  %v231_v7 = vld [vmem:[%s5989_s25 + $0x30] sm:$0xff]  ;;  %v232_v8 = vld [vmem:[%s5989_s25 + $0x38] sm:$0xff]  ;;  %v233_v9 = vld [vmem:[%s5989_s25 + $0x40] sm:$0xff]  ;;  %602 = vst.msk [vmem:[#allocation2 + $0x48] sm:$0xff] %vm591_vm2, %v6064_v35  ;;  %5599 = vmatpush3.bf16.msra.mxu1 %v5596_v40 }
  0x15   : > { %5015 = vmatprep.mubr.msk.f32.mxu0 %vm265_vm1, %v227_v3  ;;  %v234_v10 = vld [vmem:[%s5989_s25 + $0x48] sm:$0xff]  ;;  %v235_v11 = vld [vmem:[%s5989_s25 + $0x50] sm:$0xff]  ;;  %v236_v12 = vld [vmem:[%s5989_s25 + $0x58] sm:$0xff]  ;;  %603 = vst.msk [vmem:[#allocation2 + $0x50] sm:$0xff] %vm591_vm2, %v6064_v35  ;;  %5567 = vmatpush3.bf16.msra.mxu0 %v5564_v36 }
  0x16   : > { %v237_v13 = vld [vmem:[%s5989_s25 + $0x60] sm:$0xff]  ;;  %v238_v14 = vld [vmem:[%s5989_s25 + $0x68] sm:$0xff]  ;;  %v239_v15 = vld [vmem:[%s5989_s25 + $0x70] sm:$0xff]  ;;  %605 = vst.msk [vmem:[#allocation2 + $0x60] sm:$0xff] %vm591_vm2, %v6064_v35  ;;  %5569 = vmatprep.subr.bf16.mxu0 %v5568_v42  ;;  %5601 = vmatprep.subr.bf16.mxu1 %v5600_v46 }
  0x17   : > { %v240_v16 = vld [vmem:[%s5989_s25 + $0x78] sm:$0xff]  ;;  %v241_v17 = vld [vmem:[%s5989_s25 + $0x80] sm:$0xff]  ;;  %v242_v18 = vld [vmem:[%s5989_s25 + $0x88] sm:$0xff]  ;;  %606 = vst.msk [vmem:[#allocation2 + $0x68] sm:$0xff] %vm591_vm2, %v6064_v35 }
  0x18   : > { %5016 = vmatmul.mubr.msk.f32.gmra.mrb[2].mxu0 %vm265_vm1, %v228_v4  ;;  %v243_v19 = vld [vmem:[%s5989_s25 + $0x90] sm:$0xff]  ;;  %v244_v20 = vld [vmem:[%s5989_s25 + $0x98] sm:$0xff]  ;;  %v245_v21 = vld [vmem:[%s5989_s25 + $0xa0] sm:$0xff]  ;;  %608 = vst.msk [vmem:[#allocation2 + $0x78] sm:$0xff] %vm591_vm2, %v6064_v35  ;;  %5603 = vmatpush3.bf16.msra.mxu1 %v5600_v46 }
  0x19   : > { %5018 = vmatprep.mubr.msk.f32.mxu0 %vm265_vm1, %v229_v5  ;;  %v246_v22 = vld [vmem:[%s5989_s25 + $0xa8] sm:$0xff]  ;;  %v247_v23 = vld [vmem:[%s5989_s25 + $0xb0] sm:$0xff]  ;;  %v248_v24 = vld [vmem:[%s5989_s25 + $0xb8] sm:$0xff]  ;;  %609 = vst.msk [vmem:[#allocation2 + $0x80] sm:$0xff] %vm591_vm2, %v6064_v35  ;;  %5571 = vmatpush3.bf16.msra.mxu0 %v5568_v42 }
  0x1a   : > { %v249_v25 = vld [vmem:[%s5989_s25 + $0xc0] sm:$0xff]  ;;  %v250_v26 = vld [vmem:[%s5989_s25 + $0xc8] sm:$0xff]  ;;  %v251_v27 = vld [vmem:[%s5989_s25 + $0xd0] sm:$0xff]  ;;  %611 = vst.msk [vmem:[#allocation2 + $0x90] sm:$0xff] %vm591_vm2, %v6064_v35  ;;  %5605 = vmatprep.subr.bf16.mxu1 %v5604_v50 }
  0x1b   : > { %v252_v28 = vld [vmem:[%s5989_s25 + $0xd8] sm:$0xff]  ;;  %v253_v29 = vld [vmem:[%s5989_s25 + $0xe0] sm:$0xff]  ;;  %v254_v30 = vld [vmem:[%s5989_s25 + $0xe8] sm:$0xff]  ;;  %612 = vst.msk [vmem:[#allocation2 + $0x98] sm:$0xff] %vm591_vm2, %v6064_v35 }
  0x1c   : > { %5019 = vmatmul.mubr.msk.f32.gmra.mrb[4].mxu0 %vm265_vm1, %v230_v6  ;;  %v255_v31 = vld [vmem:[%s5989_s25 + $0xf0] sm:$0xff]  ;;  %v256_v32 = vld [vmem:[%s5989_s25 + $0xf8] sm:$0xff]  ;;  %614 = vst.msk [vmem:[#allocation2 + $0xa8] sm:$0xff] %vm591_vm2, %v6064_v35  ;;  %615 = vst.msk [vmem:[#allocation2 + $0xb0] sm:$0xff] %vm591_vm2, %v6064_v35 }
  0x1d   : > { %5021 = vmatprep.mubr.msk.f32.mxu0 %vm265_vm1, %v231_v7  ;;  %617 = vst.msk [vmem:[#allocation2 + $0xc0] sm:$0xff] %vm591_vm2, %v6064_v35  ;;  %618 = vst.msk [vmem:[#allocation2 + $0xc8] sm:$0xff] %vm591_vm2, %v6064_v35  ;;  %v687_v45 = vld [vmem:[#allocation2] sm:$0xff]  ;;  %v688_v47 = vld [vmem:[#allocation2 + $0x8] sm:$0xff] }
  0x1e   : > { %620 = vst.msk [vmem:[#allocation2 + $0xd8] sm:$0xff] %vm591_vm2, %v6064_v35  ;;  %621 = vst.msk [vmem:[#allocation2 + $0xe0] sm:$0xff] %vm591_vm2, %v6064_v35  ;;  %v4361_v51 = vld [vmem:[%s7296_s3 + $0x20] sm:$0xff]  ;;  %v4362_v52 = vld [vmem:[%s7296_s3 + $0x28] sm:$0xff] }
  0x1f   : > { %623 = vst.msk [vmem:[#allocation2 + $0xf0] sm:$0xff] %vm591_vm2, %v6064_v35  ;;  %624 = vst.msk [vmem:[#allocation2 + $0xf8] sm:$0xff] %vm591_vm2, %v6064_v35  ;;  %v5572_v53 = vpack.c.bf16 %v4362_v52, %v4361_v51  ;;  %v4363_v54 = vld [vmem:[%s7296_s3 + $0x30] sm:$0xff]  ;;  %v4364_v55 = vld [vmem:[%s7296_s3 + $0x38] sm:$0xff] }
  0x20   : > { %5022 = vmatmul.mubr.msk.f32.gmra.mrb[6].mxu0 %vm265_vm1, %v232_v8  ;;  %626 = vst.msk [vmem:[#allocation2 + $0x108] sm:$0xff] %vm591_vm2, %v6064_v35  ;;  %627 = vst.msk [vmem:[#allocation2 + $0x110] sm:$0xff] %vm591_vm2, %v6064_v35  ;;  %v5576_v56 = vpack.c.bf16 %v4364_v55, %v4363_v54  ;;  %v4397_v57 = vld [vmem:[%s7296_s3 + $0x40] sm:$0xff]  ;;  %v4398_v58 = vld [vmem:[%s7296_s3 + $0x48] sm:$0xff] }
  0x21   : > { %5024 = vmatprep.mubr.msk.f32.mxu0 %vm265_vm1, %v233_v9  ;;  %629 = vst.msk [vmem:[#allocation2 + $0x120] sm:$0xff] %vm591_vm2, %v6064_v35  ;;  %630 = vst.msk [vmem:[#allocation2 + $0x128] sm:$0xff] %vm591_vm2, %v6064_v35  ;;  %5573 = vmatprep.subr.bf16.mxu0 %v5572_v53  ;;  %v6218_v60 = vpack.c.bf16 %v4398_v58, %v4397_v57  ;;  %v4507_v5 = vld [vmem:[%s7296_s3 + $0xb0] sm:$0xff]  ;;  %v4508_v6 = vld [vmem:[%s7296_s3 + $0xb8] sm:$0xff] }
  0x22   : > { %632 = vst.msk [vmem:[#allocation2 + $0x138] sm:$0xff] %vm591_vm2, %v6064_v35  ;;  %633 = vst.msk [vmem:[#allocation2 + $0x140] sm:$0xff] %vm591_vm2, %v6064_v35 }
  0x23   : > { %635 = vst.msk [vmem:[#allocation2 + $0x150] sm:$0xff] %vm591_vm2, %v6064_v35  ;;  %636 = vst.msk [vmem:[#allocation2 + $0x158] sm:$0xff] %vm591_vm2, %v6064_v35 }
  0x24   : > { %5025 = vmatmul.mubr.msk.f32.gmra.mrb[8].mxu0 %vm265_vm1, %v234_v10  ;;  %638 = vst.msk [vmem:[#allocation2 + $0x168] sm:$0xff] %vm591_vm2, %v6064_v35  ;;  %639 = vst.msk [vmem:[#allocation2 + $0x170] sm:$0xff] %vm591_vm2, %v6064_v35 }
  0x25   : > { %5027 = vmatprep.mubr.msk.f32.mxu0 %vm265_vm1, %v235_v11  ;;  %641 = vst.msk [vmem:[#allocation2 + $0x180] sm:$0xff] %vm591_vm2, %v6064_v35  ;;  %642 = vst.msk [vmem:[#allocation2 + $0x188] sm:$0xff] %vm591_vm2, %v6064_v35 }
  0x26   : > { %644 = vst.msk [vmem:[#allocation2 + $0x198] sm:$0xff] %vm591_vm2, %v6064_v35  ;;  %645 = vst.msk [vmem:[#allocation2 + $0x1a0] sm:$0xff] %vm591_vm2, %v6064_v35 }
  0x27   : > { %598 = vst.msk [vmem:[#allocation2 + $0x28] sm:$0x3] %vm594_vm3, %v6064_v35  ;;  %595 = vst.msk [vmem:[#allocation2 + $0x10] sm:$0x3] %vm594_vm3, %v6064_v35 }
  0x28   : > { %5028 = vmatmul.mubr.msk.f32.gmra.mrb[10].mxu0 %vm265_vm1, %v236_v12  ;;  %601 = vst.msk [vmem:[#allocation2 + $0x40] sm:$0x3] %vm594_vm3, %v6064_v35  ;;  %604 = vst.msk [vmem:[#allocation2 + $0x58] sm:$0x3] %vm594_vm3, %v6064_v35 }
  0x29   : > { %5030 = vmatprep.mubr.msk.f32.mxu0 %vm265_vm1, %v237_v13  ;;  %607 = vst.msk [vmem:[#allocation2 + $0x70] sm:$0x3] %vm594_vm3, %v6064_v35  ;;  %610 = vst.msk [vmem:[#allocation2 + $0x88] sm:$0x3] %vm594_vm3, %v6064_v35  ;;  %v5608_v13 = vpack.c.bf16 %v4508_v6, %v4507_v5 }
  0x2a   : > { %613 = vst.msk [vmem:[#allocation2 + $0xa0] sm:$0x3] %vm594_vm3, %v6064_v35  ;;  %616 = vst.msk [vmem:[#allocation2 + $0xb8] sm:$0x3] %vm594_vm3, %v6064_v35 }
  0x2b   : > { %619 = vst.msk [vmem:[#allocation2 + $0xd0] sm:$0x3] %vm594_vm3, %v6064_v35  ;;  %622 = vst.msk [vmem:[#allocation2 + $0xe8] sm:$0x3] %vm594_vm3, %v6064_v35 }
  0x2c   : > { %5031 = vmatmul.mubr.msk.f32.gmra.mrb[12].mxu0 %vm265_vm1, %v238_v14  ;;  %625 = vst.msk [vmem:[#allocation2 + $0x100] sm:$0x3] %vm594_vm3, %v6064_v35  ;;  %628 = vst.msk [vmem:[#allocation2 + $0x118] sm:$0x3] %vm594_vm3, %v6064_v35 }
  0x2d   : > { %5033 = vmatprep.mubr.msk.f32.mxu0 %vm265_vm1, %v239_v15  ;;  %631 = vst.msk [vmem:[#allocation2 + $0x130] sm:$0x3] %vm594_vm3, %v6064_v35  ;;  %634 = vst.msk [vmem:[#allocation2 + $0x148] sm:$0x3] %vm594_vm3, %v6064_v35 }
  0x2e   : > { %637 = vst.msk [vmem:[#allocation2 + $0x160] sm:$0x3] %vm594_vm3, %v6064_v35  ;;  %640 = vst.msk [vmem:[#allocation2 + $0x178] sm:$0x3] %vm594_vm3, %v6064_v35 }
  0x2f   : > { %643 = vst.msk [vmem:[#allocation2 + $0x190] sm:$0x3] %vm594_vm3, %v6064_v35  ;;  %646 = vst.msk [vmem:[#allocation2 + $0x1a8] sm:$0x3] %vm594_vm3, %v6064_v35 }
  0x30   : > { %5034 = vmatmul.mubr.msk.f32.gmra.mrb[14].mxu0 %vm265_vm1, %v240_v16  ;;  %v4541_v16 = vld [vmem:[%s7296_s3 + $0xc0] sm:$0xff] }
  0x31   : > { %5036 = vmatprep.mubr.msk.f32.mxu0 %vm265_vm1, %v241_v17  ;;  %v4542_v17 = vld [vmem:[%s7296_s3 + $0xc8] sm:$0xff] }
  0x34   : > { %5037 = vmatmul.mubr.msk.f32.gmra.mrb[16].mxu0 %vm265_vm1, %v242_v18 }
  0x35   : > { %5039 = vmatprep.mubr.msk.f32.mxu0 %vm265_vm1, %v243_v19 }
  0x38   : > { %5040 = vmatmul.mubr.msk.f32.gmra.mrb[18].mxu0 %vm265_vm1, %v244_v20 }
  0x39   : > { %5042 = vmatprep.mubr.msk.f32.mxu0 %vm265_vm1, %v245_v21 }
  0x3c   : > { %5043 = vmatmul.mubr.msk.f32.gmra.mrb[20].mxu0 %vm265_vm1, %v246_v22 }
  0x3d   : > { %5045 = vmatprep.mubr.msk.f32.mxu0 %vm265_vm1, %v247_v23 }
  0x40   : > { %5046 = vmatmul.mubr.msk.f32.gmra.mrb[22].mxu0 %vm265_vm1, %v248_v24  ;;  %v6270_v24 = vpack.c.bf16 %v4542_v17, %v4541_v16 }
  0x41   : > { %5048 = vmatprep.mubr.msk.f32.mxu0 %vm265_vm1, %v249_v25 }
  0x44   : > { %5049 = vmatmul.mubr.msk.f32.gmra.mrb[24].mxu0 %vm265_vm1, %v250_v26 }
  0x45   : > { %5051 = vmatprep.mubr.msk.f32.mxu0 %vm265_vm1, %v251_v27 }
  0x48   : > { %5052 = vmatmul.mubr.msk.f32.gmra.mrb[26].mxu0 %vm265_vm1, %v252_v28 }
  0x49   : > { %5054 = vmatprep.mubr.msk.f32.mxu0 %vm265_vm1, %v253_v29 }
  0x4c   : > { %5055 = vmatmul.mubr.msk.f32.gmra.mrb[28].mxu0 %vm265_vm1, %v254_v30 }
  0x4d   : > { %5057 = vmatprep.mubr.msk.f32.mxu0 %vm265_vm1, %v255_v31 }
  0x50   : > { %5058 = vmatmul.mubr.msk.f32.gmra.mrb[30].mxu0 %vm265_vm1, %v256_v32 }
  0x51   : > { %5068 = vmatprep.mubr.msk.f32.mxu0 %vm591_vm2, %v687_v45 }
  0x54   : > { %5069 = vmatmul.mubr.msk.f32.vlgmr.msra.gmra.mrb[32].mxu0 %vm591_vm2, %v688_v47 }
  0x55   : > { %5575 = vmatpush3.bf16.msra.mxu0 %v5572_v53 }
  0x56   : > { %5577 = vmatprep.subr.bf16.mxu0 %v5576_v56 }
  0x59   : > { %5579 = vmatpush3.bf16.msra.mxu0 %v5576_v56 }
  0x5a   : > { %5581 = vmatprep.subr.bf16.mxu0 %v6218_v60 }
  0xe7   : > { %v5014_v59 = vpop.f32.mrb[0].mxu0 }
  0xe8   : > { %v438_v61 = vadd.f32 %v5014_v59, %v6064_v35  ;;  %v432_v62 = vpop.f32.mrb[1].mxu0 }
  0xe9   : > { %v433_v63 = vadd.f32 %v6064_v35, %v432_v62 }
  0xea   : > { %649 = vst.msk [vmem:[#allocation2 + $0x21] sm:$0xff] %vm591_vm2, %v438_v61 }
  0xeb   : > { %648 = vst.msk [vmem:[#allocation2 + $0x19] sm:$0xff] %vm591_vm2, %v433_v63  ;;  %v5017_v0 = vpop.f32.mrb[2].mxu0 }
  0xec   : > { %v448_v1 = vadd.f32 %v5017_v0, %v6064_v35  ;;  %v442_v2 = vpop.f32.mrb[3].mxu0 }
  0xed   : > { %v443_v3 = vadd.f32 %v6064_v35, %v442_v2 }
  0xee   : > { %651 = vst.msk [vmem:[#allocation2 + $0x39] sm:$0xff] %vm591_vm2, %v448_v1 }
  0xef   : > { %650 = vst.msk [vmem:[#allocation2 + $0x31] sm:$0xff] %vm591_vm2, %v443_v3  ;;  %v5020_v4 = vpop.f32.mrb[4].mxu0 }
  0xf0   : > { %v458_v7 = vadd.f32 %v5020_v4, %v6064_v35  ;;  %v452_v8 = vpop.f32.mrb[5].mxu0 }
  0xf1   : > { %v453_v9 = vadd.f32 %v6064_v35, %v452_v8  ;;  %v6249_v15 = vld [vmem:[#allocation2 + $0x21] sm:$0xff] }
  0xf2   : > { %653 = vst.msk [vmem:[#allocation2 + $0x51] sm:$0xff] %vm591_vm2, %v458_v7  ;;  %v6238_v10 = vld [vmem:[#allocation2 + $0x18] sm:$0xff]  ;;  %v6242_v12 = vld [vmem:[#allocation2 + $0x20] sm:$0xff] }
  0xf3   : > { %7346 = vst [vmem:[#allocation3_spill] sm:$0xff] %v6238_v10  ;;  %v6240_v11 = vld [vmem:[#allocation2 + $0x19] sm:$0xff]  ;;  %7347 = vst [vmem:[#allocation4_spill] sm:$0xff] %v6242_v12  ;;  %v5023_v14 = vpop.f32.mrb[6].mxu0  ;;  %5071 = vmatprep.mubr.msk.f32.mxu0 %vm591_vm2, %v6238_v10  ;;  %v1077_v10 = vld [vmem:[#allocation2 + $0x9] sm:$0xff] }
  0xf4   : > { %652 = vst.msk [vmem:[#allocation2 + $0x49] sm:$0xff] %vm591_vm2, %v453_v9  ;;  %5292 = vmatprep.mubr.msk.f32.mxu1 %vm591_vm2, %v6240_v11  ;;  %v468_v18 = vadd.f32 %v5023_v14, %v6064_v35  ;;  %v462_v19 = vpop.f32.mrb[7].mxu0  ;;  %5072 = vmatmul.mubr.msk.f32.gmra.mrb[34].mxu0 %vm591_vm2, %v6242_v12  ;;  %v4400_v12 = vld [vmem:[%s7296_s3 + $0x58] sm:$0xff] }
  0xf5   : > { %5293 = vmatmul.mubr.msk.f32.vlgmr.msra.gmra.mrb[0].mxu1 %vm591_vm2, %v6249_v15  ;;  %v463_v20 = vadd.f32 %v6064_v35, %v462_v19  ;;  %v6277_v26 = vld [vmem:[#allocation2 + $0x39] sm:$0xff] }
  0xf6   : > { %5607 = vmatpush3.bf16.msra.mxu1 %v5604_v50  ;;  %655 = vst.msk [vmem:[#allocation2 + $0x69] sm:$0xff] %vm591_vm2, %v468_v18  ;;  %v6264_v21 = vld [vmem:[#allocation2 + $0x30] sm:$0xff]  ;;  %v6268_v23 = vld [vmem:[#allocation2 + $0x38] sm:$0xff]  ;;  %7348 = vst [vmem:[#allocation5_spill] sm:$0xff] %v6277_v26 }
  0xf7   : > { %v6266_v22 = vld [vmem:[#allocation2 + $0x31] sm:$0xff]  ;;  %5609 = vmatprep.subr.bf16.mxu1 %v5608_v13  ;;  %654 = vst.msk [vmem:[#allocation2 + $0x61] sm:$0xff] %vm591_vm2, %v463_v20  ;;  %v5026_v25 = vpop.f32.mrb[8].mxu0  ;;  %5074 = vmatprep.mubr.msk.f32.mxu0 %vm591_vm2, %v6264_v21 }
  0xf8   : > { %5295 = vmatprep.mubr.msk.f32.mxu1 %vm591_vm2, %v6266_v22  ;;  %v478_v27 = vadd.f32 %v5026_v25, %v6064_v35  ;;  %v472_v28 = vpop.f32.mrb[9].mxu0  ;;  %5075 = vmatmul.mubr.msk.f32.gmra.mrb[36].mxu0 %vm591_vm2, %v6268_v23 }
  0xf9   : > { %5296 = vmatmul.mubr.msk.f32.gmra.mrb[2].mxu1 %vm591_vm2, %v6277_v26  ;;  %v473_v29 = vadd.f32 %v6064_v35, %v472_v28  ;;  %v6298_v34 = vld [vmem:[#allocation2 + $0x51] sm:$0xff] }
  0xfa   : > { %5611 = vmatpush3.bf16.msra.mxu1 %v5608_v13  ;;  %657 = vst.msk [vmem:[#allocation2 + $0x81] sm:$0xff] %vm591_vm2, %v478_v27  ;;  %7350 = vst [vmem:[#allocation7_spill] sm:$0xff] %v6298_v34 }
  0xfb   : > { %v6286_v30 = vld [vmem:[#allocation2 + $0x48] sm:$0xff]  ;;  %v6290_v32 = vld [vmem:[#allocation2 + $0x50] sm:$0xff]  ;;  %5613 = vmatprep.subr.bf16.mxu1 %v6270_v24  ;;  %656 = vst.msk [vmem:[#allocation2 + $0x79] sm:$0xff] %vm591_vm2, %v473_v29  ;;  %v5029_v33 = vpop.f32.mrb[10].mxu0 }
  0xfc   : > { %v6288_v31 = vld [vmem:[#allocation2 + $0x49] sm:$0xff]  ;;  %5077 = vmatprep.mubr.msk.f32.mxu0 %vm591_vm2, %v6286_v30  ;;  %v488_v36 = vadd.f32 %v5029_v33, %v6064_v35  ;;  %v482_v37 = vpop.f32.mrb[11].mxu0 }
  0xfd   : > { %7349 = vst [vmem:[#allocation6_spill] sm:$0xff] %v6288_v31  ;;  %5298 = vmatprep.mubr.msk.f32.mxu1 %vm591_vm2, %v6288_v31  ;;  %5078 = vmatmul.mubr.msk.f32.gmra.mrb[38].mxu0 %vm591_vm2, %v6290_v32  ;;  %v483_v38 = vadd.f32 %v6064_v35, %v482_v37  ;;  %v6318_v43 = vld [vmem:[#allocation2 + $0x69] sm:$0xff] }
  0xfe   : > { %5299 = vmatmul.mubr.msk.f32.gmra.mrb[4].mxu1 %vm591_vm2, %v6298_v34  ;;  %659 = vst.msk [vmem:[#allocation2 + $0x99] sm:$0xff] %vm591_vm2, %v488_v36  ;;  %v6307_v39 = vld [vmem:[#allocation2 + $0x60] sm:$0xff]  ;;  %v6311_v41 = vld [vmem:[#allocation2 + $0x68] sm:$0xff]  ;;  %7352 = vst [vmem:[#allocation9_spill] sm:$0xff] %v6318_v43 }
  0xff   : > { %v6309_v40 = vld [vmem:[#allocation2 + $0x61] sm:$0xff]  ;;  %658 = vst.msk [vmem:[#allocation2 + $0x91] sm:$0xff] %vm591_vm2, %v483_v38  ;;  %v5032_v42 = vpop.f32.mrb[12].mxu0  ;;  %5080 = vmatprep.mubr.msk.f32.mxu0 %vm591_vm2, %v6307_v39 }
 0x100   : > { %7351 = vst [vmem:[#allocation8_spill] sm:$0xff] %v6309_v40  ;;  %5301 = vmatprep.mubr.msk.f32.mxu1 %vm591_vm2, %v6309_v40  ;;  %v498_v44 = vadd.f32 %v5032_v42, %v6064_v35  ;;  %v492_v45 = vpop.f32.mrb[13].mxu0 }
 0x101   : > { %5081 = vmatmul.mubr.msk.f32.gmra.mrb[40].mxu0 %vm591_vm2, %v6311_v41  ;;  %v493_v46 = vadd.f32 %v6064_v35, %v492_v45  ;;  %v6338_v51 = vld [vmem:[#allocation2 + $0x81] sm:$0xff] }
 0x102   : > { %5302 = vmatmul.mubr.msk.f32.gmra.mrb[6].mxu1 %vm591_vm2, %v6318_v43  ;;  %661 = vst.msk [vmem:[#allocation2 + $0xb1] sm:$0xff] %vm591_vm2, %v498_v44  ;;  %v6327_v47 = vld [vmem:[#allocation2 + $0x78] sm:$0xff]  ;;  %v6331_v49 = vld [vmem:[#allocation2 + $0x80] sm:$0xff]  ;;  %7354 = vst [vmem:[#allocation11_spill] sm:$0xff] %v6338_v51 }
 0x103   : > { %v6329_v48 = vld [vmem:[#allocation2 + $0x79] sm:$0xff]  ;;  %660 = vst.msk [vmem:[#allocation2 + $0xa9] sm:$0xff] %vm591_vm2, %v493_v46  ;;  %v5035_v50 = vpop.f32.mrb[14].mxu0  ;;  %5083 = vmatprep.mubr.msk.f32.mxu0 %vm591_vm2, %v6327_v47 }
 0x104   : > { %7353 = vst [vmem:[#allocation10_spill] sm:$0xff] %v6329_v48  ;;  %5304 = vmatprep.mubr.msk.f32.mxu1 %vm591_vm2, %v6329_v48  ;;  %v508_v52 = vadd.f32 %v5035_v50, %v6064_v35  ;;  %v502_v53 = vpop.f32.mrb[15].mxu0 }
 0x105   : > { %5084 = vmatmul.mubr.msk.f32.gmra.mrb[42].mxu0 %vm591_vm2, %v6331_v49  ;;  %v503_v54 = vadd.f32 %v6064_v35, %v502_v53  ;;  %v6358_v59 = vld [vmem:[#allocation2 + $0x99] sm:$0xff] }
 0x106   : > { %5305 = vmatmul.mubr.msk.f32.gmra.mrb[8].mxu1 %vm591_vm2, %v6338_v51  ;;  %663 = vst.msk [vmem:[#allocation2 + $0xc9] sm:$0xff] %vm591_vm2, %v508_v52  ;;  %v6347_v55 = vld [vmem:[#allocation2 + $0x90] sm:$0xff]  ;;  %v6351_v57 = vld [vmem:[#allocation2 + $0x98] sm:$0xff]  ;;  %7356 = vst [vmem:[#allocation13_spill] sm:$0xff] %v6358_v59 }
 0x107   : > { %v6349_v56 = vld [vmem:[#allocation2 + $0x91] sm:$0xff]  ;;  %662 = vst.msk [vmem:[#allocation2 + $0xc1] sm:$0xff] %vm591_vm2, %v503_v54  ;;  %v5038_v58 = vpop.f32.mrb[16].mxu0  ;;  %5086 = vmatprep.mubr.msk.f32.mxu0 %vm591_vm2, %v6347_v55 }
 0x108   : > { %7355 = vst [vmem:[#allocation12_spill] sm:$0xff] %v6349_v56  ;;  %5307 = vmatprep.mubr.msk.f32.mxu1 %vm591_vm2, %v6349_v56  ;;  %v518_v61 = vadd.f32 %v5038_v58, %v6064_v35  ;;  %v512_v62 = vpop.f32.mrb[17].mxu0 }
 0x109   : > { %5087 = vmatmul.mubr.msk.f32.gmra.mrb[44].mxu0 %vm591_vm2, %v6351_v57  ;;  %v513_v63 = vadd.f32 %v6064_v35, %v512_v62  ;;  %v6378_v4 = vld [vmem:[#allocation2 + $0xb1] sm:$0xff] }
 0x10a   : > { %5308 = vmatmul.mubr.msk.f32.gmra.mrb[10].mxu1 %vm591_vm2, %v6358_v59  ;;  %665 = vst.msk [vmem:[#allocation2 + $0xe1] sm:$0xff] %vm591_vm2, %v518_v61  ;;  %v6367_v0 = vld [vmem:[#allocation2 + $0xa8] sm:$0xff]  ;;  %v6371_v2 = vld [vmem:[#allocation2 + $0xb0] sm:$0xff]  ;;  %7358 = vst [vmem:[#allocation15_spill] sm:$0xff] %v6378_v4 }
 0x10b   : > { %v6369_v1 = vld [vmem:[#allocation2 + $0xa9] sm:$0xff]  ;;  %664 = vst.msk [vmem:[#allocation2 + $0xd9] sm:$0xff] %vm591_vm2, %v513_v63  ;;  %v5041_v3 = vpop.f32.mrb[18].mxu0  ;;  %5089 = vmatprep.mubr.msk.f32.mxu0 %vm591_vm2, %v6367_v0 }
 0x10c   : > { %7357 = vst [vmem:[#allocation14_spill] sm:$0xff] %v6369_v1  ;;  %5310 = vmatprep.mubr.msk.f32.mxu1 %vm591_vm2, %v6369_v1  ;;  %v528_v5 = vadd.f32 %v5041_v3, %v6064_v35  ;;  %v522_v6 = vpop.f32.mrb[19].mxu0 }
 0x10d   : > { %5090 = vmatmul.mubr.msk.f32.gmra.mrb[46].mxu0 %vm591_vm2, %v6371_v2  ;;  %v523_v7 = vadd.f32 %v6064_v35, %v522_v6  ;;  %v6398_v16 = vld [vmem:[#allocation2 + $0xc9] sm:$0xff] }
 0x10e   : > { %5311 = vmatmul.mubr.msk.f32.gmra.mrb[12].mxu1 %vm591_vm2, %v6378_v4  ;;  %667 = vst.msk [vmem:[#allocation2 + $0xf9] sm:$0xff] %vm591_vm2, %v528_v5  ;;  %v6387_v8 = vld [vmem:[#allocation2 + $0xc0] sm:$0xff]  ;;  %v6391_v13 = vld [vmem:[#allocation2 + $0xc8] sm:$0xff]  ;;  %7360 = vst [vmem:[#allocation17_spill] sm:$0xff] %v6398_v16 }
 0x10f   : > { %v6389_v9 = vld [vmem:[#allocation2 + $0xc1] sm:$0xff]  ;;  %666 = vst.msk [vmem:[#allocation2 + $0xf1] sm:$0xff] %vm591_vm2, %v523_v7  ;;  %v5044_v14 = vpop.f32.mrb[20].mxu0  ;;  %5092 = vmatprep.mubr.msk.f32.mxu0 %vm591_vm2, %v6387_v8 }
 0x110   : > { %7359 = vst [vmem:[#allocation16_spill] sm:$0xff] %v6389_v9  ;;  %5313 = vmatprep.mubr.msk.f32.mxu1 %vm591_vm2, %v6389_v9  ;;  %v538_v17 = vadd.f32 %v5044_v14, %v6064_v35  ;;  %v532_v18 = vpop.f32.mrb[21].mxu0 }
 0x111   : > { %5093 = vmatmul.mubr.msk.f32.gmra.mrb[48].mxu0 %vm591_vm2, %v6391_v13  ;;  %v533_v19 = vadd.f32 %v6064_v35, %v532_v18  ;;  %v6418_v29 = vld [vmem:[#allocation2 + $0xe1] sm:$0xff] }
 0x112   : > { %5314 = vmatmul.mubr.msk.f32.gmra.mrb[14].mxu1 %vm591_vm2, %v6398_v16  ;;  %669 = vst.msk [vmem:[#allocation2 + $0x111] sm:$0xff] %vm591_vm2, %v538_v17  ;;  %v6407_v20 = vld [vmem:[#allocation2 + $0xd8] sm:$0xff]  ;;  %v6411_v27 = vld [vmem:[#allocation2 + $0xe0] sm:$0xff]  ;;  %7362 = vst [vmem:[#allocation19_spill] sm:$0xff] %v6418_v29 }
 0x113   : > { %v6409_v25 = vld [vmem:[#allocation2 + $0xd9] sm:$0xff]  ;;  %668 = vst.msk [vmem:[#allocation2 + $0x109] sm:$0xff] %vm591_vm2, %v533_v19  ;;  %v5047_v28 = vpop.f32.mrb[22].mxu0  ;;  %5095 = vmatprep.mubr.msk.f32.mxu0 %vm591_vm2, %v6407_v20 }
 0x114   : > { %7361 = vst [vmem:[#allocation18_spill] sm:$0xff] %v6409_v25  ;;  %5316 = vmatprep.mubr.msk.f32.mxu1 %vm591_vm2, %v6409_v25  ;;  %v548_v33 = vadd.f32 %v5047_v28, %v6064_v35  ;;  %v542_v36 = vpop.f32.mrb[23].mxu0 }
 0x115   : > { %5096 = vmatmul.mubr.msk.f32.gmra.mrb[50].mxu0 %vm591_vm2, %v6411_v27  ;;  %v543_v37 = vadd.f32 %v6064_v35, %v542_v36  ;;  %v6438_v46 = vld [vmem:[#allocation2 + $0xf9] sm:$0xff] }
 0x116   : > { %5317 = vmatmul.mubr.msk.f32.gmra.mrb[16].mxu1 %vm591_vm2, %v6418_v29  ;;  %671 = vst.msk [vmem:[#allocation2 + $0x129] sm:$0xff] %vm591_vm2, %v548_v33  ;;  %v6427_v38 = vld [vmem:[#allocation2 + $0xf0] sm:$0xff]  ;;  %v6431_v44 = vld [vmem:[#allocation2 + $0xf8] sm:$0xff]  ;;  %7364 = vst [vmem:[#allocation21_spill] sm:$0xff] %v6438_v46 }
 0x117   : > { %v6429_v42 = vld [vmem:[#allocation2 + $0xf1] sm:$0xff]  ;;  %670 = vst.msk [vmem:[#allocation2 + $0x121] sm:$0xff] %vm591_vm2, %v543_v37  ;;  %v5050_v45 = vpop.f32.mrb[24].mxu0  ;;  %5098 = vmatprep.mubr.msk.f32.mxu0 %vm591_vm2, %v6427_v38 }
 0x118   : > { %7363 = vst [vmem:[#allocation20_spill] sm:$0xff] %v6429_v42  ;;  %5319 = vmatprep.mubr.msk.f32.mxu1 %vm591_vm2, %v6429_v42  ;;  %v558_v50 = vadd.f32 %v5050_v45, %v6064_v35  ;;  %v552_v52 = vpop.f32.mrb[25].mxu0 }
 0x119   : > { %5099 = vmatmul.mubr.msk.f32.gmra.mrb[52].mxu0 %vm591_vm2, %v6431_v44  ;;  %v553_v53 = vadd.f32 %v6064_v35, %v552_v52  ;;  %v6458_v63 = vld [vmem:[#allocation2 + $0x111] sm:$0xff] }
 0x11a   : > { %5320 = vmatmul.mubr.msk.f32.gmra.mrb[18].mxu1 %vm591_vm2, %v6438_v46  ;;  %673 = vst.msk [vmem:[#allocation2 + $0x141] sm:$0xff] %vm591_vm2, %v558_v50  ;;  %v6447_v54 = vld [vmem:[#allocation2 + $0x108] sm:$0xff]  ;;  %v6451_v61 = vld [vmem:[#allocation2 + $0x110] sm:$0xff]  ;;  %7366 = vst [vmem:[#allocation23_spill] sm:$0xff] %v6458_v63 }
 0x11b   : > { %v6449_v58 = vld [vmem:[#allocation2 + $0x109] sm:$0xff]  ;;  %672 = vst.msk [vmem:[#allocation2 + $0x139] sm:$0xff] %vm591_vm2, %v553_v53  ;;  %v5053_v62 = vpop.f32.mrb[26].mxu0  ;;  %5101 = vmatprep.mubr.msk.f32.mxu0 %vm591_vm2, %v6447_v54 }
 0x11c   : > { %7365 = vst [vmem:[#allocation22_spill] sm:$0xff] %v6449_v58  ;;  %5322 = vmatprep.mubr.msk.f32.mxu1 %vm591_vm2, %v6449_v58  ;;  %v568_v3 = vadd.f32 %v5053_v62, %v6064_v35  ;;  %v562_v5 = vpop.f32.mrb[27].mxu0 }
 0x11d   : > { %5102 = vmatmul.mubr.msk.f32.gmra.mrb[54].mxu0 %vm591_vm2, %v6451_v61  ;;  %v563_v6 = vadd.f32 %v6064_v35, %v562_v5  ;;  %v6478_v19 = vld [vmem:[#allocation2 + $0x129] sm:$0xff] }
 0x11e   : > { %5323 = vmatmul.mubr.msk.f32.gmra.mrb[20].mxu1 %vm591_vm2, %v6458_v63  ;;  %675 = vst.msk [vmem:[#allocation2 + $0x159] sm:$0xff] %vm591_vm2, %v568_v3  ;;  %v6467_v7 = vld [vmem:[#allocation2 + $0x120] sm:$0xff]  ;;  %v6471_v17 = vld [vmem:[#allocation2 + $0x128] sm:$0xff]  ;;  %7368 = vst [vmem:[#allocation25_spill] sm:$0xff] %v6478_v19 }
 0x11f   : > { %v6469_v14 = vld [vmem:[#allocation2 + $0x121] sm:$0xff]  ;;  %674 = vst.msk [vmem:[#allocation2 + $0x151] sm:$0xff] %vm591_vm2, %v563_v6  ;;  %v5056_v18 = vpop.f32.mrb[28].mxu0  ;;  %5104 = vmatprep.mubr.msk.f32.mxu0 %vm591_vm2, %v6467_v7 }
 0x120   : > { %7367 = vst [vmem:[#allocation24_spill] sm:$0xff] %v6469_v14  ;;  %5325 = vmatprep.mubr.msk.f32.mxu1 %vm591_vm2, %v6469_v14  ;;  %v578_v28 = vadd.f32 %v5056_v18, %v6064_v35  ;;  %v572_v33 = vpop.f32.mrb[29].mxu0 }
 0x121   : > { %5105 = vmatmul.mubr.msk.f32.gmra.mrb[56].mxu0 %vm591_vm2, %v6471_v17  ;;  %v573_v36 = vadd.f32 %v6064_v35, %v572_v33  ;;  %v6498_v53 = vld [vmem:[#allocation2 + $0x141] sm:$0xff] }
 0x122   : > { %5326 = vmatmul.mubr.msk.f32.gmra.mrb[22].mxu1 %vm591_vm2, %v6478_v19  ;;  %677 = vst.msk [vmem:[#allocation2 + $0x171] sm:$0xff] %vm591_vm2, %v578_v28  ;;  %v6487_v37 = vld [vmem:[#allocation2 + $0x138] sm:$0xff]  ;;  %v6491_v50 = vld [vmem:[#allocation2 + $0x140] sm:$0xff]  ;;  %7372 = vst [vmem:[#allocation29_spill] sm:$0xff] %v6498_v53 }
 0x123   : > { %7369 = vst [vmem:[#allocation26_spill] sm:$0xff] %v6487_v37  ;;  %v6489_v45 = vld [vmem:[#allocation2 + $0x139] sm:$0xff]  ;;  %7371 = vst [vmem:[#allocation28_spill] sm:$0xff] %v6491_v50  ;;  %v5059_v52 = vpop.f32.mrb[30].mxu0  ;;  %5107 = vmatprep.mubr.msk.f32.mxu0 %vm591_vm2, %v6487_v37  ;;  %v6569_v37 = vld [vmem:[#allocation2 + $0x22] sm:$0xff] }
 0x124   : > { %7370 = vst [vmem:[#allocation27_spill] sm:$0xff] %v6489_v45  ;;  %676 = vst.msk [vmem:[#allocation2 + $0x169] sm:$0xff] %vm591_vm2, %v573_v36  ;;  %5328 = vmatprep.mubr.msk.f32.mxu1 %vm591_vm2, %v6489_v45  ;;  %v588_v62 = vadd.f32 %v5059_v52, %v6064_v35  ;;  %v582_v3 = vpop.f32.mrb[31].mxu0 }
 0x125   : > { %5108 = vmatmul.mubr.msk.f32.gmra.mrb[58].mxu0 %vm591_vm2, %v6491_v50  ;;  %v583_v5 = vadd.f32 %v6064_v35, %v582_v3  ;;  %v6518_v33 = vld [vmem:[#allocation2 + $0x159] sm:$0xff]  ;;  %v1076_v35 = vld [vmem:[#allocation2 + $0x1] sm:$0xff] }
 0x126   : > { %5329 = vmatmul.mubr.msk.f32.gmra.mrb[24].mxu1 %vm591_vm2, %v6498_v53  ;;  %679 = vst.msk [vmem:[#allocation2 + $0x189] sm:$0xff] %vm591_vm2, %v588_v62  ;;  %v6507_v6 = vld [vmem:[#allocation2 + $0x150] sm:$0xff]  ;;  %v6511_v28 = vld [vmem:[#allocation2 + $0x158] sm:$0xff]  ;;  %7376 = vst [vmem:[#allocation33_spill] sm:$0xff] %v6518_v33 }
 0x127   : > { %7373 = vst [vmem:[#allocation30_spill] sm:$0xff] %v6507_v6  ;;  %v6509_v18 = vld [vmem:[#allocation2 + $0x151] sm:$0xff]  ;;  %7375 = vst [vmem:[#allocation32_spill] sm:$0xff] %v6511_v28  ;;  %5110 = vmatprep.mubr.msk.f32.mxu0 %vm591_vm2, %v6507_v6 }
 0x128   : > { %7374 = vst [vmem:[#allocation31_spill] sm:$0xff] %v6509_v18  ;;  %678 = vst.msk [vmem:[#allocation2 + $0x181] sm:$0xff] %vm591_vm2, %v583_v5  ;;  %5331 = vmatprep.mubr.msk.f32.mxu1 %vm591_vm2, %v6509_v18  ;;  %v4399_v5 = vld [vmem:[%s7296_s3 + $0x50] sm:$0xff]  ;;  %v4544_v6 = vld [vmem:[%s7296_s3 + $0xd8] sm:$0xff] }
 0x129   : > { %5111 = vmatmul.mubr.msk.f32.gmra.mrb[60].mxu0 %vm591_vm2, %v6511_v28  ;;  %v6534_v3 = vld [vmem:[#allocation2 + $0x171] sm:$0xff]  ;;  %v5584_v50 = vpack.c.bf16 %v4400_v12, %v4399_v5  ;;  %v4434_v12 = vld [vmem:[%s7296_s3 + $0x68] sm:$0xff] }
 0x12a   : > { %5332 = vmatmul.mubr.msk.f32.gmra.mrb[26].mxu1 %vm591_vm2, %v6518_v33  ;;  %7380 = vst [vmem:[#allocation37_spill] sm:$0xff] %v6534_v3  ;;  %v4543_v28 = vld [vmem:[%s7296_s3 + $0xd0] sm:$0xff] }
 0x12b   : > { %v6524_v36 = vld [vmem:[#allocation2 + $0x168] sm:$0xff]  ;;  %v6528_v62 = vld [vmem:[#allocation2 + $0x170] sm:$0xff] }
 0x12c   : > { %7377 = vst [vmem:[#allocation34_spill] sm:$0xff] %v6524_v36  ;;  %v6526_v52 = vld [vmem:[#allocation2 + $0x169] sm:$0xff]  ;;  %7379 = vst [vmem:[#allocation36_spill] sm:$0xff] %v6528_v62  ;;  %5113 = vmatprep.mubr.msk.f32.mxu0 %vm591_vm2, %v6524_v36 }
 0x12d   : > { %7378 = vst [vmem:[#allocation35_spill] sm:$0xff] %v6526_v52  ;;  %5334 = vmatprep.mubr.msk.f32.mxu1 %vm591_vm2, %v6526_v52  ;;  %5114 = vmatmul.mubr.msk.f32.gmra.mrb[62].mxu0 %vm591_vm2, %v6528_v62  ;;  %v6551_v62 = vld [vmem:[#allocation2 + $0x189] sm:$0xff] }
 0x12e   : > { %5335 = vmatmul.mubr.msk.f32.gmra.mrb[28].mxu1 %vm591_vm2, %v6534_v3  ;;  %5124 = vmatprep.mubr.msk.f32.mxu0 %vm591_vm2, %v1076_v35  ;;  %7382 = vst [vmem:[#allocation39_spill] sm:$0xff] %v6551_v62  ;;  %v6562_v35 = vld [vmem:[#allocation2 + $0x1a] sm:$0xff] }
 0x12f   : > { %v6547_v36 = vld [vmem:[#allocation2 + $0x181] sm:$0xff] }
 0x130   : > { %7381 = vst [vmem:[#allocation38_spill] sm:$0xff] %v6547_v36  ;;  %5337 = vmatprep.mubr.msk.f32.mxu1 %vm591_vm2, %v6547_v36  ;;  %v5616_v36 = vpack.c.bf16 %v4544_v6, %v4543_v28  ;;  %v6590_v6 = vld [vmem:[#allocation2 + $0x32] sm:$0xff]  ;;  %v6596_v28 = vld [vmem:[#allocation2 + $0x3a] sm:$0xff] }
 0x131   : > { %5125 = vmatmul.mubr.msk.f32.vlgmr.msra.gmra.mrb[32].mxu0 %vm591_vm2, %v1077_v10  ;;  %v4433_v10 = vld [vmem:[%s7296_s3 + $0x60] sm:$0xff] }
 0x132   : > { %5338 = vmatmul.mubr.msk.f32.gmra.mrb[30].mxu1 %vm591_vm2, %v6551_v62  ;;  %5127 = vmatprep.mubr.msk.f32.mxu0 %vm591_vm2, %v6240_v11  ;;  %v4578_v11 = vld [vmem:[%s7296_s3 + $0xe8] sm:$0xff]  ;;  %v6648_v62 = vld [vmem:[#allocation2 + $0x9a] sm:$0xff] }
 0x133   : > { %5348 = vmatprep.mubr.msk.f32.mxu1 %vm591_vm2, %v6562_v35  ;;  %5583 = vmatpush3.bf16.msra.mxu0 %v6218_v60  ;;  %v4577_v60 = vld [vmem:[%s7296_s3 + $0xe0] sm:$0xff] }
 0x134   : > { %5585 = vmatprep.subr.bf16.mxu0 %v5584_v50  ;;  %v6598_v5 = vpack.c.bf16 %v4578_v11, %v4577_v60  ;;  %v6636_v60 = vld [vmem:[#allocation2 + $0x82] sm:$0xff]  ;;  %v6642_v11 = vld [vmem:[#allocation2 + $0x92] sm:$0xff] }
 0x135   : > { %5128 = vmatmul.mubr.msk.f32.gmra.mrb[34].mxu0 %vm591_vm2, %v6249_v15  ;;  %v6594_v15 = vpack.c.bf16 %v4434_v12, %v4433_v10  ;;  %v6618_v10 = vld [vmem:[#allocation2 + $0x62] sm:$0xff]  ;;  %v6630_v12 = vld [vmem:[#allocation2 + $0x7a] sm:$0xff] }
 0x136   : > { %5349 = vmatmul.mubr.msk.f32.vlgmr.msra.gmra.mrb[0].mxu1 %vm591_vm2, %v6569_v37  ;;  %5130 = vmatprep.mubr.msk.f32.mxu0 %vm591_vm2, %v6266_v22 }
 0x137   : > { %5615 = vmatpush3.bf16.msra.mxu1 %v6270_v24  ;;  %5351 = vmatprep.mubr.msk.f32.mxu1 %vm591_vm2, %v6590_v6  ;;  %v6604_v24 = vld [vmem:[#allocation2 + $0x4a] sm:$0xff] }
 0x138   : > { %5617 = vmatprep.subr.bf16.mxu1 %v5616_v36  ;;  %5587 = vmatpush3.bf16.msra.mxu0 %v5584_v50  ;;  %v6611_v50 = vld [vmem:[#allocation2 + $0x52] sm:$0xff] }
 0x139   : > { %5131 = vmatmul.mubr.msk.f32.gmra.mrb[36].mxu0 %vm591_vm2, %v6277_v26  ;;  %5589 = vmatprep.subr.bf16.mxu0 %v6594_v15 }
 0x13a   : > { %5352 = vmatmul.mubr.msk.f32.gmra.mrb[2].mxu1 %vm591_vm2, %v6596_v28  ;;  %5133 = vmatprep.mubr.msk.f32.mxu0 %vm591_vm2, %v6288_v31  ;;  %v4580_v31 = vld [vmem:[%s7296_s3 + $0xf8] sm:$0xff] }
 0x13b   : > { %5354 = vmatprep.mubr.msk.f32.mxu1 %vm591_vm2, %v6604_v24  ;;  %5619 = vmatpush3.bf16.msra.mxu1 %v5616_v36  ;;  %v6624_v36 = vld [vmem:[#allocation2 + $0x6a] sm:$0xff] }
 0x13c   : > { %5621 = vmatprep.subr.bf16.mxu1 %v6598_v5 }
 0x13d   : > { %5134 = vmatmul.mubr.msk.f32.gmra.mrb[38].mxu0 %vm591_vm2, %v6298_v34  ;;  %v4579_v34 = vld [vmem:[%s7296_s3 + $0xf0] sm:$0xff] }
 0x13e   : > { %5355 = vmatmul.mubr.msk.f32.gmra.mrb[4].mxu1 %vm591_vm2, %v6611_v50  ;;  %5136 = vmatprep.mubr.msk.f32.mxu0 %vm591_vm2, %v6309_v40  ;;  %v1467_v40 = vld [vmem:[#allocation2 + $0xa] sm:$0xff] }
 0x13f   : > { %5357 = vmatprep.mubr.msk.f32.mxu1 %vm591_vm2, %v6618_v10 }
 0x141   : > { %5137 = vmatmul.mubr.msk.f32.gmra.mrb[40].mxu0 %vm591_vm2, %v6318_v43  ;;  %v4435_v43 = vld [vmem:[%s7296_s3 + $0x70] sm:$0xff] }
 0x142   : > { %5358 = vmatmul.mubr.msk.f32.gmra.mrb[6].mxu1 %vm591_vm2, %v6624_v36  ;;  %5139 = vmatprep.mubr.msk.f32.mxu0 %vm591_vm2, %v6329_v48  ;;  %v6756_v48 = vld [vmem:[#allocation2 + $0x172] sm:$0xff] }
 0x143   : > { %5360 = vmatprep.mubr.msk.f32.mxu1 %vm591_vm2, %v6630_v12 }
 0x145   : > { %5140 = vmatmul.mubr.msk.f32.gmra.mrb[42].mxu0 %vm591_vm2, %v6338_v51  ;;  %v6654_v51 = vld [vmem:[#allocation2 + $0xaa] sm:$0xff] }
 0x146   : > { %5361 = vmatmul.mubr.msk.f32.gmra.mrb[8].mxu1 %vm591_vm2, %v6636_v60  ;;  %5142 = vmatprep.mubr.msk.f32.mxu0 %vm591_vm2, %v6349_v56  ;;  %v6660_v56 = vld [vmem:[#allocation2 + $0xb2] sm:$0xff] }
 0x147   : > { %5363 = vmatprep.mubr.msk.f32.mxu1 %vm591_vm2, %v6642_v11 }
 0x149   : > { %5143 = vmatmul.mubr.msk.f32.gmra.mrb[44].mxu0 %vm591_vm2, %v6358_v59  ;;  %v6666_v59 = vld [vmem:[#allocation2 + $0xc2] sm:$0xff] }
 0x14a   : > { %5364 = vmatmul.mubr.msk.f32.gmra.mrb[10].mxu1 %vm591_vm2, %v6648_v62  ;;  %5145 = vmatprep.mubr.msk.f32.mxu0 %vm591_vm2, %v6369_v1  ;;  %v6672_v1 = vld [vmem:[#allocation2 + $0xca] sm:$0xff] }
 0x14b   : > { %5366 = vmatprep.mubr.msk.f32.mxu1 %vm591_vm2, %v6654_v51 }
 0x14d   : > { %5146 = vmatmul.mubr.msk.f32.gmra.mrb[46].mxu0 %vm591_vm2, %v6378_v4  ;;  %v6678_v4 = vld [vmem:[#allocation2 + $0xda] sm:$0xff] }
 0x14e   : > { %5367 = vmatmul.mubr.msk.f32.gmra.mrb[12].mxu1 %vm591_vm2, %v6660_v56  ;;  %5148 = vmatprep.mubr.msk.f32.mxu0 %vm591_vm2, %v6389_v9  ;;  %v6684_v9 = vld [vmem:[#allocation2 + $0xe2] sm:$0xff] }
 0x14f   : > { %5369 = vmatprep.mubr.msk.f32.mxu1 %vm591_vm2, %v6666_v59 }
 0x151   : > { %5149 = vmatmul.mubr.msk.f32.gmra.mrb[48].mxu0 %vm591_vm2, %v6398_v16  ;;  %v6690_v16 = vld [vmem:[#allocation2 + $0xf2] sm:$0xff] }
 0x152   : > { %5370 = vmatmul.mubr.msk.f32.gmra.mrb[14].mxu1 %vm591_vm2, %v6672_v1  ;;  %5151 = vmatprep.mubr.msk.f32.mxu0 %vm591_vm2, %v6409_v25  ;;  %v6696_v25 = vld [vmem:[#allocation2 + $0xfa] sm:$0xff] }
 0x153   : > { %5372 = vmatprep.mubr.msk.f32.mxu1 %vm591_vm2, %v6678_v4 }
 0x155   : > { %5152 = vmatmul.mubr.msk.f32.gmra.mrb[50].mxu0 %vm591_vm2, %v6418_v29  ;;  %v6702_v29 = vld [vmem:[#allocation2 + $0x10a] sm:$0xff] }
 0x156   : > { %5373 = vmatmul.mubr.msk.f32.gmra.mrb[16].mxu1 %vm591_vm2, %v6684_v9  ;;  %5154 = vmatprep.mubr.msk.f32.mxu0 %vm591_vm2, %v6429_v42  ;;  %v6708_v42 = vld [vmem:[#allocation2 + $0x112] sm:$0xff] }
 0x157   : > { %5375 = vmatprep.mubr.msk.f32.mxu1 %vm591_vm2, %v6690_v16 }
 0x159   : > { %5155 = vmatmul.mubr.msk.f32.gmra.mrb[52].mxu0 %vm591_vm2, %v6438_v46  ;;  %v6714_v46 = vld [vmem:[#allocation2 + $0x122] sm:$0xff] }
 0x15a   : > { %5376 = vmatmul.mubr.msk.f32.gmra.mrb[18].mxu1 %vm591_vm2, %v6696_v25  ;;  %5157 = vmatprep.mubr.msk.f32.mxu0 %vm591_vm2, %v6449_v58  ;;  %v6720_v58 = vld [vmem:[#allocation2 + $0x12a] sm:$0xff] }
 0x15b   : > { %5378 = vmatprep.mubr.msk.f32.mxu1 %vm591_vm2, %v6702_v29 }
 0x15d   : > { %5158 = vmatmul.mubr.msk.f32.gmra.mrb[54].mxu0 %vm591_vm2, %v6458_v63  ;;  %v6726_v63 = vld [vmem:[#allocation2 + $0x13a] sm:$0xff] }
 0x15e   : > { %5379 = vmatmul.mubr.msk.f32.gmra.mrb[20].mxu1 %vm591_vm2, %v6708_v42  ;;  %5160 = vmatprep.mubr.msk.f32.mxu0 %vm591_vm2, %v6469_v14  ;;  %v6732_v14 = vld [vmem:[#allocation2 + $0x142] sm:$0xff] }
 0x15f   : > { %5381 = vmatprep.mubr.msk.f32.mxu1 %vm591_vm2, %v6714_v46 }
 0x161   : > { %5161 = vmatmul.mubr.msk.f32.gmra.mrb[56].mxu0 %vm591_vm2, %v6478_v19  ;;  %v6738_v19 = vld [vmem:[#allocation2 + $0x152] sm:$0xff] }
 0x162   : > { %5382 = vmatmul.mubr.msk.f32.gmra.mrb[22].mxu1 %vm591_vm2, %v6720_v58  ;;  %5163 = vmatprep.mubr.msk.f32.mxu0 %vm591_vm2, %v6489_v45  ;;  %v6744_v45 = vld [vmem:[#allocation2 + $0x15a] sm:$0xff] }
 0x163   : > { %5384 = vmatprep.mubr.msk.f32.mxu1 %vm591_vm2, %v6726_v63  ;;  %7383 = vst [vmem:[#allocation40_spill] sm:$0xff] %v6744_v45 }
 0x165   : > { %5164 = vmatmul.mubr.msk.f32.gmra.mrb[58].mxu0 %vm591_vm2, %v6498_v53  ;;  %v6750_v53 = vld [vmem:[#allocation2 + $0x16a] sm:$0xff] }
 0x166   : > { %5385 = vmatmul.mubr.msk.f32.gmra.mrb[24].mxu1 %vm591_vm2, %v6732_v14  ;;  %5166 = vmatprep.mubr.msk.f32.mxu0 %vm591_vm2, %v6509_v18  ;;  %7384 = vst [vmem:[#allocation41_spill] sm:$0xff] %v6750_v53  ;;  %v1466_v18 = vld [vmem:[#allocation2 + $0x2] sm:$0xff] }
 0x167   : > { %5387 = vmatprep.mubr.msk.f32.mxu1 %vm591_vm2, %v6738_v19 }
 0x169   : > { %5167 = vmatmul.mubr.msk.f32.gmra.mrb[60].mxu0 %vm591_vm2, %v6518_v33  ;;  %v6762_v33 = vld [vmem:[#allocation2 + $0x182] sm:$0xff] }
 0x16a   : > { %5388 = vmatmul.mubr.msk.f32.gmra.mrb[26].mxu1 %vm591_vm2, %v6744_v45  ;;  %5169 = vmatprep.mubr.msk.f32.mxu0 %vm591_vm2, %v6526_v52  ;;  %7385 = vst [vmem:[#allocation42_spill] sm:$0xff] %v6762_v33  ;;  %v4436_v52 = vld [vmem:[%s7296_s3 + $0x78] sm:$0xff] }
 0x16b   : > { %5390 = vmatprep.mubr.msk.f32.mxu1 %vm591_vm2, %v6750_v53  ;;  %v5592_v26 = vpack.c.bf16 %v4436_v52, %v4435_v43  ;;  %v4614_v43 = vld [vmem:[%s7296_s3 + $0x108] sm:$0xff]  ;;  %v7390_v52 = vld [vmem:[#allocation32_spill] sm:$0xff] }
 0x16d   : > { %5170 = vmatmul.mubr.msk.f32.gmra.mrb[62].mxu0 %vm591_vm2, %v6534_v3  ;;  %v6773_v3 = vld [vmem:[#allocation2 + $0x18a] sm:$0xff] }
 0x16e   : > { %5391 = vmatmul.mubr.msk.f32.gmra.mrb[28].mxu1 %vm591_vm2, %v6756_v48  ;;  %5180 = vmatprep.mubr.msk.f32.mxu0 %vm591_vm2, %v1466_v18  ;;  %7386 = vst [vmem:[#allocation43_spill] sm:$0xff] %v6773_v3  ;;  %v5624_v18 = vpack.c.bf16 %v4580_v31, %v4579_v34  ;;  %v7388_v34 = vld [vmem:[#allocation28_spill] sm:$0xff] }
 0x16f   : > { %5393 = vmatprep.mubr.msk.f32.mxu1 %vm591_vm2, %v6762_v33  ;;  %v4615_v33 = vld [vmem:[%s7296_s3 + $0x110] sm:$0xff] }
 0x171   : > { %5181 = vmatmul.mubr.msk.f32.vlgmr.msra.gmra.mrb[32].mxu0 %vm591_vm2, %v1467_v40  ;;  %v4613_v40 = vld [vmem:[%s7296_s3 + $0x100] sm:$0xff] }
 0x172   : > { %5394 = vmatmul.mubr.msk.f32.gmra.mrb[30].mxu1 %vm591_vm2, %v6773_v3  ;;  %5183 = vmatprep.mubr.msk.f32.mxu0 %vm591_vm2, %v6562_v35  ;;  %v6804_v31 = vpack.c.bf16 %v4614_v43, %v4613_v40  ;;  %v7391_v35 = vld [vmem:[#allocation34_spill] sm:$0xff]  ;;  %v7393_v43 = vld [vmem:[#allocation3_spill] sm:$0xff]  ;;  %v3058_v3 = vld [vmem:[#allocation2 + $0x1a0] sm:$0xff] }
 0x173   : > { %5404 = vmatprep.mubr.msk.f32.mxu1 %vm591_vm2, %v6264_v21  ;;  %5591 = vmatpush3.bf16.msra.mxu0 %v6594_v15  ;;  %v7392_v15 = vld [vmem:[#allocation36_spill] sm:$0xff]  ;;  %v6913_v40 = vld [vmem:[#allocation2 + $0x188] sm:$0xff] }
 0x174   : > { %5593 = vmatprep.subr.bf16.mxu0 %v5592_v26 }
 0x175   : > { %5184 = vmatmul.mubr.msk.f32.gmra.mrb[34].mxu0 %vm591_vm2, %v6569_v37  ;;  %v7389_v37 = vld [vmem:[#allocation30_spill] sm:$0xff] }
 0x176   : > { %5405 = vmatmul.mubr.msk.f32.vlgmr.msra.gmra.mrb[0].mxu1 %vm591_vm2, %v6268_v23  ;;  %5186 = vmatprep.mubr.msk.f32.mxu0 %vm591_vm2, %v6590_v6 }
 0x177   : > { %5623 = vmatpush3.bf16.msra.mxu1 %v6598_v5  ;;  %5407 = vmatprep.mubr.msk.f32.mxu1 %vm591_vm2, %v6286_v30  ;;  %v6907_v5 = vld [vmem:[#allocation2 + $0x180] sm:$0xff] }
 0x178   : > { %5625 = vmatprep.subr.bf16.mxu1 %v5624_v18  ;;  %5595 = vmatpush3.bf16.msra.mxu0 %v5592_v26  ;;  %v7387_v26 = vld [vmem:[#allocation26_spill] sm:$0xff] }
 0x179   : > { %5187 = vmatmul.mubr.msk.f32.gmra.mrb[36].mxu0 %vm591_vm2, %v6596_v28 }
 0x17a   : > { %5408 = vmatmul.mubr.msk.f32.gmra.mrb[2].mxu1 %vm591_vm2, %v6290_v32  ;;  %5189 = vmatprep.mubr.msk.f32.mxu0 %vm591_vm2, %v6604_v24 }
 0x17b   : > { %5410 = vmatprep.mubr.msk.f32.mxu1 %vm591_vm2, %v6307_v39  ;;  %5627 = vmatpush3.bf16.msra.mxu1 %v5624_v18  ;;  %v3057_v18 = vld [vmem:[#allocation2 + $0x198] sm:$0xff] }
 0x17c   : > { %5629 = vmatprep.subr.bf16.mxu1 %v6804_v31 }
 0x17d   : > { %5190 = vmatmul.mubr.msk.f32.gmra.mrb[38].mxu0 %vm591_vm2, %v6611_v50 }
 0x17e   : > { %5411 = vmatmul.mubr.msk.f32.gmra.mrb[4].mxu1 %vm591_vm2, %v6311_v41  ;;  %5192 = vmatprep.mubr.msk.f32.mxu0 %vm591_vm2, %v6618_v10 }
 0x17f   : > { %5413 = vmatprep.mubr.msk.f32.mxu1 %vm591_vm2, %v6327_v47 }
 0x181   : > { %5193 = vmatmul.mubr.msk.f32.gmra.mrb[40].mxu0 %vm591_vm2, %v6624_v36 }
 0x182   : > { %5414 = vmatmul.mubr.msk.f32.gmra.mrb[6].mxu1 %vm591_vm2, %v6331_v49  ;;  %5195 = vmatprep.mubr.msk.f32.mxu0 %vm591_vm2, %v6630_v12 }
 0x183   : > { %5416 = vmatprep.mubr.msk.f32.mxu1 %vm591_vm2, %v6347_v55 }
 0x185   : > { %5196 = vmatmul.mubr.msk.f32.gmra.mrb[42].mxu0 %vm591_vm2, %v6636_v60 }
 0x186   : > { %5417 = vmatmul.mubr.msk.f32.gmra.mrb[8].mxu1 %vm591_vm2, %v6351_v57  ;;  %5198 = vmatprep.mubr.msk.f32.mxu0 %vm591_vm2, %v6642_v11 }
 0x187   : > { %5419 = vmatprep.mubr.msk.f32.mxu1 %vm591_vm2, %v6367_v0 }
 0x189   : > { %5199 = vmatmul.mubr.msk.f32.gmra.mrb[44].mxu0 %vm591_vm2, %v6648_v62 }
 0x18a   : > { %5420 = vmatmul.mubr.msk.f32.gmra.mrb[10].mxu1 %vm591_vm2, %v6371_v2  ;;  %5201 = vmatprep.mubr.msk.f32.mxu0 %vm591_vm2, %v6654_v51 }
 0x18b   : > { %5422 = vmatprep.mubr.msk.f32.mxu1 %vm591_vm2, %v6387_v8 }
 0x18d   : > { %5202 = vmatmul.mubr.msk.f32.gmra.mrb[46].mxu0 %vm591_vm2, %v6660_v56 }
 0x18e   : > { %5423 = vmatmul.mubr.msk.f32.gmra.mrb[12].mxu1 %vm591_vm2, %v6391_v13  ;;  %5204 = vmatprep.mubr.msk.f32.mxu0 %vm591_vm2, %v6666_v59 }
 0x18f   : > { %5425 = vmatprep.mubr.msk.f32.mxu1 %vm591_vm2, %v6407_v20 }
 0x191   : > { %5205 = vmatmul.mubr.msk.f32.gmra.mrb[48].mxu0 %vm591_vm2, %v6672_v1 }
 0x192   : > { %5426 = vmatmul.mubr.msk.f32.gmra.mrb[14].mxu1 %vm591_vm2, %v6411_v27  ;;  %5207 = vmatprep.mubr.msk.f32.mxu0 %vm591_vm2, %v6678_v4 }
 0x193   : > { %5428 = vmatprep.mubr.msk.f32.mxu1 %vm591_vm2, %v6427_v38 }
 0x195   : > { %5208 = vmatmul.mubr.msk.f32.gmra.mrb[50].mxu0 %vm591_vm2, %v6684_v9 }
 0x196   : > { %5429 = vmatmul.mubr.msk.f32.gmra.mrb[16].mxu1 %vm591_vm2, %v6431_v44  ;;  %5210 = vmatprep.mubr.msk.f32.mxu0 %vm591_vm2, %v6690_v16 }
 0x197   : > { %5431 = vmatprep.mubr.msk.f32.mxu1 %vm591_vm2, %v6447_v54 }
 0x199   : > { %5211 = vmatmul.mubr.msk.f32.gmra.mrb[52].mxu0 %vm591_vm2, %v6696_v25 }
 0x19a   : > { %5432 = vmatmul.mubr.msk.f32.gmra.mrb[18].mxu1 %vm591_vm2, %v6451_v61  ;;  %5213 = vmatprep.mubr.msk.f32.mxu0 %vm591_vm2, %v6702_v29 }
 0x19b   : > { %5434 = vmatprep.mubr.msk.f32.mxu1 %vm591_vm2, %v6467_v7 }
 0x19d   : > { %5214 = vmatmul.mubr.msk.f32.gmra.mrb[54].mxu0 %vm591_vm2, %v6708_v42 }
 0x19e   : > { %5435 = vmatmul.mubr.msk.f32.gmra.mrb[20].mxu1 %vm591_vm2, %v6471_v17  ;;  %5216 = vmatprep.mubr.msk.f32.mxu0 %vm591_vm2, %v6714_v46 }
 0x19f   : > { %5437 = vmatprep.mubr.msk.f32.mxu1 %vm591_vm2, %v7387_v26 }
 0x1a1   : > { %5217 = vmatmul.mubr.msk.f32.gmra.mrb[56].mxu0 %vm591_vm2, %v6720_v58 }
 0x1a2   : > { %5438 = vmatmul.mubr.msk.f32.gmra.mrb[22].mxu1 %vm591_vm2, %v7388_v34  ;;  %5219 = vmatprep.mubr.msk.f32.mxu0 %vm591_vm2, %v6726_v63 }
 0x1a3   : > { %5440 = vmatprep.mubr.msk.f32.mxu1 %vm591_vm2, %v7389_v37 }
 0x1a5   : > { %5220 = vmatmul.mubr.msk.f32.gmra.mrb[58].mxu0 %vm591_vm2, %v6732_v14 }
 0x1a6   : > { %5441 = vmatmul.mubr.msk.f32.gmra.mrb[24].mxu1 %vm591_vm2, %v7390_v52  ;;  %5222 = vmatprep.mubr.msk.f32.mxu0 %vm591_vm2, %v6738_v19 }
 0x1a7   : > { %5443 = vmatprep.mubr.msk.f32.mxu1 %vm591_vm2, %v7391_v35 }
 0x1a9   : > { %5223 = vmatmul.mubr.msk.f32.gmra.mrb[60].mxu0 %vm591_vm2, %v6744_v45  ;;  %v7394_v45 = vld [vmem:[#allocation4_spill] sm:$0xff] }
 0x1aa   : > { %5444 = vmatmul.mubr.msk.f32.gmra.mrb[26].mxu1 %vm591_vm2, %v7392_v15  ;;  %5225 = vmatprep.mubr.msk.f32.mxu0 %vm591_vm2, %v6750_v53  ;;  %v4616_v53 = vld [vmem:[%s7296_s3 + $0x118] sm:$0xff] }
 0x1ab   : > { %5446 = vmatprep.mubr.msk.f32.mxu1 %vm591_vm2, %v6907_v5 }
 0x1ad   : > { %5226 = vmatmul.mubr.msk.f32.gmra.mrb[62].mxu0 %vm591_vm2, %v6756_v48 }
 0x1ae   : > { %5447 = vmatmul.mubr.msk.f32.gmra.mrb[28].mxu1 %vm591_vm2, %v6913_v40  ;;  %5236 = vmatprep.mubr.msk.f32.mxu0 %vm591_vm2, %v7393_v43  ;;  %v7395_v43 = vld [vmem:[#allocation5_spill] sm:$0xff] }
 0x1af   : > { %5449 = vmatprep.mubr.msk.f32.mxu1 %vm591_vm2, %v3057_v18  ;;  %v5632_v18 = vpack.c.bf16 %v4616_v53, %v4615_v33  ;;  %v7420_v53 = vld [vmem:[#allocation35_spill] sm:$0xff]  ;;  %v7421_v33 = vld [vmem:[#allocation37_spill] sm:$0xff] }
 0x1b1   : > { %5237 = vmatmul.mubr.msk.f32.vlgmr.msra.gmra.mrb[32].mxu0 %vm591_vm2, %v7394_v45  ;;  %v7396_v45 = vld [vmem:[#allocation6_spill] sm:$0xff] }
 0x1b2   : > { %5450 = vmatmul.mubr.msk.f32.gmra.mrb[30].mxu1 %vm591_vm2, %v3058_v3  ;;  %5239 = vmatprep.mubr.msk.f32.mxu0 %vm591_vm2, %v6264_v21  ;;  %v7397_v21 = vld [vmem:[#allocation7_spill] sm:$0xff]  ;;  %v7422_v3 = vld [vmem:[#allocation38_spill] sm:$0xff] }
 0x1b3   : > { %5460 = vmatprep.mubr.msk.f32.mxu1 %vm591_vm2, %v6266_v22  ;;  %v7398_v22 = vld [vmem:[#allocation8_spill] sm:$0xff] }
 0x1b5   : > { %5240 = vmatmul.mubr.msk.f32.gmra.mrb[34].mxu0 %vm591_vm2, %v6268_v23  ;;  %v7399_v23 = vld [vmem:[#allocation9_spill] sm:$0xff] }
 0x1b6   : > { %5461 = vmatmul.mubr.msk.f32.vlgmr.msra.gmra.mrb[0].mxu1 %vm591_vm2, %v7395_v43  ;;  %5242 = vmatprep.mubr.msk.f32.mxu0 %vm591_vm2, %v6286_v30  ;;  %v7400_v30 = vld [vmem:[#allocation10_spill] sm:$0xff] }
 0x1b7   : > { %5631 = vmatpush3.bf16.msra.mxu1 %v6804_v31  ;;  %5463 = vmatprep.mubr.msk.f32.mxu1 %vm591_vm2, %v7396_v45  ;;  %v3447_v31 = vld [vmem:[#allocation2 + $0x199] sm:$0xff] }
 0x1b8   : > { %5633 = vmatprep.subr.bf16.mxu1 %v5632_v18 }
 0x1b9   : > { %5243 = vmatmul.mubr.msk.f32.gmra.mrb[36].mxu0 %vm591_vm2, %v6290_v32  ;;  %v7401_v32 = vld [vmem:[#allocation11_spill] sm:$0xff] }
 0x1ba   : > { %5464 = vmatmul.mubr.msk.f32.gmra.mrb[2].mxu1 %vm591_vm2, %v7397_v21  ;;  %5245 = vmatprep.mubr.msk.f32.mxu0 %vm591_vm2, %v6307_v39  ;;  %v7402_v39 = vld [vmem:[#allocation12_spill] sm:$0xff] }
 0x1bb   : > { %5466 = vmatprep.mubr.msk.f32.mxu1 %vm591_vm2, %v7398_v22  ;;  %5635 = vmatpush3.bf16.msra.mxu1 %v5632_v18 }
 0x1bd   : > { %5246 = vmatmul.mubr.msk.f32.gmra.mrb[38].mxu0 %vm591_vm2, %v6311_v41  ;;  %v7403_v41 = vld [vmem:[#allocation13_spill] sm:$0xff] }
 0x1be   : > { %5467 = vmatmul.mubr.msk.f32.gmra.mrb[4].mxu1 %vm591_vm2, %v7399_v23  ;;  %5248 = vmatprep.mubr.msk.f32.mxu0 %vm591_vm2, %v6327_v47  ;;  %v7404_v47 = vld [vmem:[#allocation14_spill] sm:$0xff] }
 0x1bf   : > { %5469 = vmatprep.mubr.msk.f32.mxu1 %vm591_vm2, %v7400_v30  ;;  %v7163_v30 = vld [vmem:[%s7297_s4] ss:$0 sm:$0xff] }
 0x1c1   : > { %5249 = vmatmul.mubr.msk.f32.gmra.mrb[40].mxu0 %vm591_vm2, %v6331_v49  ;;  %v7405_v49 = vld [vmem:[#allocation15_spill] sm:$0xff] }
 0x1c2   : > { %5470 = vmatmul.mubr.msk.f32.gmra.mrb[6].mxu1 %vm591_vm2, %v7401_v32  ;;  %5251 = vmatprep.mubr.msk.f32.mxu0 %vm591_vm2, %v6347_v55  ;;  %v7406_v55 = vld [vmem:[#allocation16_spill] sm:$0xff] }
 0x1c3   : > { %5472 = vmatprep.mubr.msk.f32.mxu1 %vm591_vm2, %v7402_v39 }
 0x1c5   : > { %5252 = vmatmul.mubr.msk.f32.gmra.mrb[42].mxu0 %vm591_vm2, %v6351_v57  ;;  %v7407_v57 = vld [vmem:[#allocation17_spill] sm:$0xff] }
 0x1c6   : > { %5473 = vmatmul.mubr.msk.f32.gmra.mrb[8].mxu1 %vm591_vm2, %v7403_v41  ;;  %5254 = vmatprep.mubr.msk.f32.mxu0 %vm591_vm2, %v6367_v0  ;;  %v7408_v0 = vld [vmem:[#allocation18_spill] sm:$0xff] }
 0x1c7   : > { %5475 = vmatprep.mubr.msk.f32.mxu1 %vm591_vm2, %v7404_v47 }
 0x1c9   : > { %5255 = vmatmul.mubr.msk.f32.gmra.mrb[44].mxu0 %vm591_vm2, %v6371_v2  ;;  %v7409_v2 = vld [vmem:[#allocation19_spill] sm:$0xff] }
 0x1ca   : > { %5476 = vmatmul.mubr.msk.f32.gmra.mrb[10].mxu1 %vm591_vm2, %v7405_v49  ;;  %5257 = vmatprep.mubr.msk.f32.mxu0 %vm591_vm2, %v6387_v8  ;;  %v7410_v8 = vld [vmem:[#allocation20_spill] sm:$0xff] }
 0x1cb   : > { %5478 = vmatprep.mubr.msk.f32.mxu1 %vm591_vm2, %v7406_v55 }
 0x1cd   : > { %5258 = vmatmul.mubr.msk.f32.gmra.mrb[46].mxu0 %vm591_vm2, %v6391_v13  ;;  %v7411_v13 = vld [vmem:[#allocation21_spill] sm:$0xff] }
 0x1ce   : > { %5479 = vmatmul.mubr.msk.f32.gmra.mrb[12].mxu1 %vm591_vm2, %v7407_v57  ;;  %5260 = vmatprep.mubr.msk.f32.mxu0 %vm591_vm2, %v6407_v20  ;;  %v7412_v20 = vld [vmem:[#allocation22_spill] sm:$0xff] }
 0x1cf   : > { %5481 = vmatprep.mubr.msk.f32.mxu1 %vm591_vm2, %v7408_v0 }
 0x1d1   : > { %5261 = vmatmul.mubr.msk.f32.gmra.mrb[48].mxu0 %vm591_vm2, %v6411_v27  ;;  %v7413_v27 = vld [vmem:[#allocation23_spill] sm:$0xff] }
 0x1d2   : > { %5482 = vmatmul.mubr.msk.f32.gmra.mrb[14].mxu1 %vm591_vm2, %v7409_v2  ;;  %5263 = vmatprep.mubr.msk.f32.mxu0 %vm591_vm2, %v6427_v38  ;;  %v7414_v38 = vld [vmem:[#allocation24_spill] sm:$0xff] }
 0x1d3   : > { %5484 = vmatprep.mubr.msk.f32.mxu1 %vm591_vm2, %v7410_v8 }
 0x1d5   : > { %5264 = vmatmul.mubr.msk.f32.gmra.mrb[50].mxu0 %vm591_vm2, %v6431_v44  ;;  %v7415_v44 = vld [vmem:[#allocation25_spill] sm:$0xff] }
 0x1d6   : > { %5485 = vmatmul.mubr.msk.f32.gmra.mrb[16].mxu1 %vm591_vm2, %v7411_v13  ;;  %5266 = vmatprep.mubr.msk.f32.mxu0 %vm591_vm2, %v6447_v54  ;;  %v7416_v54 = vld [vmem:[#allocation27_spill] sm:$0xff] }
 0x1d7   : > { %5487 = vmatprep.mubr.msk.f32.mxu1 %vm591_vm2, %v7412_v20 }
 0x1d9   : > { %5267 = vmatmul.mubr.msk.f32.gmra.mrb[52].mxu0 %vm591_vm2, %v6451_v61  ;;  %v7417_v61 = vld [vmem:[#allocation29_spill] sm:$0xff] }
 0x1da   : > { %5488 = vmatmul.mubr.msk.f32.gmra.mrb[18].mxu1 %vm591_vm2, %v7413_v27  ;;  %5269 = vmatprep.mubr.msk.f32.mxu0 %vm591_vm2, %v6467_v7  ;;  %v7418_v7 = vld [vmem:[#allocation31_spill] sm:$0xff] }
 0x1db   : > { %5490 = vmatprep.mubr.msk.f32.mxu1 %vm591_vm2, %v7414_v38 }
 0x1dd   : > { %5270 = vmatmul.mubr.msk.f32.gmra.mrb[54].mxu0 %vm591_vm2, %v6471_v17  ;;  %v7419_v17 = vld [vmem:[#allocation33_spill] sm:$0xff] }
 0x1de   : > { %5491 = vmatmul.mubr.msk.f32.gmra.mrb[20].mxu1 %vm591_vm2, %v7415_v44  ;;  %5272 = vmatprep.mubr.msk.f32.mxu0 %vm591_vm2, %v7387_v26  ;;  %v7423_v26 = vld [vmem:[#allocation39_spill] sm:$0xff] }
 0x1df   : > { %5493 = vmatprep.mubr.msk.f32.mxu1 %vm591_vm2, %v7416_v54 }
 0x1e1   : > { %5273 = vmatmul.mubr.msk.f32.gmra.mrb[56].mxu0 %vm591_vm2, %v7388_v34  ;;  %v3448_v34 = vld [vmem:[#allocation2 + $0x1a1] sm:$0xff] }
 0x1e2   : > { %5494 = vmatmul.mubr.msk.f32.gmra.mrb[22].mxu1 %vm591_vm2, %v7417_v61  ;;  %5275 = vmatprep.mubr.msk.f32.mxu0 %vm591_vm2, %v7389_v37 }
 0x1e3   : > { %5496 = vmatprep.mubr.msk.f32.mxu1 %vm591_vm2, %v7418_v7 }
 0x1e5   : > { %5276 = vmatmul.mubr.msk.f32.gmra.mrb[58].mxu0 %vm591_vm2, %v7390_v52 }
 0x1e6   : > { %5497 = vmatmul.mubr.msk.f32.gmra.mrb[24].mxu1 %vm591_vm2, %v7419_v17  ;;  %5278 = vmatprep.mubr.msk.f32.mxu0 %vm591_vm2, %v7391_v35 }
 0x1e7   : > { %5499 = vmatprep.mubr.msk.f32.mxu1 %vm591_vm2, %v7420_v53 }
 0x1e9   : > { %5279 = vmatmul.mubr.msk.f32.gmra.mrb[60].mxu0 %vm591_vm2, %v7392_v15 }
 0x1ea   : > { %5500 = vmatmul.mubr.msk.f32.gmra.mrb[26].mxu1 %vm591_vm2, %v7421_v33  ;;  %5281 = vmatprep.mubr.msk.f32.mxu0 %vm591_vm2, %v6907_v5 }
 0x1eb   : > { %5502 = vmatprep.mubr.msk.f32.mxu1 %vm591_vm2, %v7422_v3 }
 0x1ed   : > { %5282 = vmatmul.mubr.msk.f32.gmra.mrb[62].mxu0 %vm591_vm2, %v6913_v40 }
 0x1ee   : > { %5503 = vmatmul.mubr.msk.f32.gmra.mrb[28].mxu1 %vm591_vm2, %v7423_v26 }
 0x1ef   : > { %5505 = vmatprep.mubr.msk.f32.mxu1 %vm591_vm2, %v3447_v31 }
 0x1f2   : > { %5506 = vmatmul.mubr.msk.f32.gmra.mrb[30].mxu1 %vm591_vm2, %v3448_v34 }
 0x1f3   : > { %5516 = vmatprep.mubr.msk.f32.mxu1 %vm591_vm2, %v6590_v6 }
 0x1f6   : > { %5517 = vmatmul.mubr.msk.f32.vlgmr.msra.gmra.mrb[0].mxu1 %vm591_vm2, %v6596_v28 }
 0x1f7   : > { %5519 = vmatprep.mubr.msk.f32.mxu1 %vm591_vm2, %v6604_v24 }
 0x1fa   : > { %5520 = vmatmul.mubr.msk.f32.gmra.mrb[2].mxu1 %vm591_vm2, %v6611_v50 }
 0x1fb   : > { %5522 = vmatprep.mubr.msk.f32.mxu1 %vm591_vm2, %v6618_v10 }
 0x1fe   : > { %5523 = vmatmul.mubr.msk.f32.gmra.mrb[4].mxu1 %vm591_vm2, %v6624_v36 }
 0x1ff   : > { %5525 = vmatprep.mubr.msk.f32.mxu1 %vm591_vm2, %v6630_v12 }
 0x202   : > { %5526 = vmatmul.mubr.msk.f32.gmra.mrb[6].mxu1 %vm591_vm2, %v6636_v60 }
 0x203   : > { %5528 = vmatprep.mubr.msk.f32.mxu1 %vm591_vm2, %v6642_v11 }
 0x206   : > { %5529 = vmatmul.mubr.msk.f32.gmra.mrb[8].mxu1 %vm591_vm2, %v6648_v62 }
 0x207   : > { %5531 = vmatprep.mubr.msk.f32.mxu1 %vm591_vm2, %v6654_v51  ;;  %v7424_v51 = vld [vmem:[#allocation40_spill] sm:$0xff] }
 0x20a   : > { %5532 = vmatmul.mubr.msk.f32.gmra.mrb[10].mxu1 %vm591_vm2, %v6660_v56  ;;  %v7425_v56 = vld [vmem:[#allocation41_spill] sm:$0xff] }
 0x20b   : > { %5534 = vmatprep.mubr.msk.f32.mxu1 %vm591_vm2, %v6666_v59  ;;  %v7426_v59 = vld [vmem:[#allocation42_spill] sm:$0xff] }
 0x20e   : > { %5535 = vmatmul.mubr.msk.f32.gmra.mrb[12].mxu1 %vm591_vm2, %v6672_v1  ;;  %v3837_v1 = vld [vmem:[#allocation2 + $0x19a] sm:$0xff] }
 0x20f   : > { %5537 = vmatprep.mubr.msk.f32.mxu1 %vm591_vm2, %v6678_v4  ;;  %v7427_v4 = vld [vmem:[#allocation43_spill] sm:$0xff] }
 0x212   : > { %5538 = vmatmul.mubr.msk.f32.gmra.mrb[14].mxu1 %vm591_vm2, %v6684_v9  ;;  %v3838_v9 = vld [vmem:[#allocation2 + $0x1a2] sm:$0xff] }
 0x213   : > { %5540 = vmatprep.mubr.msk.f32.mxu1 %vm591_vm2, %v6690_v16 }
 0x216   : > { %5541 = vmatmul.mubr.msk.f32.gmra.mrb[16].mxu1 %vm591_vm2, %v6696_v25 }
 0x217   : > { %5543 = vmatprep.mubr.msk.f32.mxu1 %vm591_vm2, %v6702_v29 }
 0x21a   : > { %5544 = vmatmul.mubr.msk.f32.gmra.mrb[18].mxu1 %vm591_vm2, %v6708_v42 }
 0x21b   : > { %5546 = vmatprep.mubr.msk.f32.mxu1 %vm591_vm2, %v6714_v46 }
 0x21e   : > { %5547 = vmatmul.mubr.msk.f32.gmra.mrb[20].mxu1 %vm591_vm2, %v6720_v58 }
 0x21f   : > { %5549 = vmatprep.mubr.msk.f32.mxu1 %vm591_vm2, %v6726_v63 }
 0x222   : > { %5550 = vmatmul.mubr.msk.f32.gmra.mrb[22].mxu1 %vm591_vm2, %v6732_v14 }
 0x223   : > { %5552 = vmatprep.mubr.msk.f32.mxu1 %vm591_vm2, %v6738_v19 }
 0x226   : > { %5553 = vmatmul.mubr.msk.f32.gmra.mrb[24].mxu1 %vm591_vm2, %v7424_v51 }
 0x227   : > { %5555 = vmatprep.mubr.msk.f32.mxu1 %vm591_vm2, %v7425_v56 }
 0x22a   : > { %5556 = vmatmul.mubr.msk.f32.gmra.mrb[26].mxu1 %vm591_vm2, %v6756_v48 }
 0x22b   : > { %5558 = vmatprep.mubr.msk.f32.mxu1 %vm591_vm2, %v7426_v59 }
 0x22e   : > { %5559 = vmatmul.mubr.msk.f32.gmra.mrb[28].mxu1 %vm591_vm2, %v7427_v4 }
 0x22f   : > { %5561 = vmatprep.mubr.msk.f32.mxu1 %vm591_vm2, %v3837_v1 }
 0x232   : > { %5562 = vmatmul.mubr.msk.f32.gmra.mrb[30].mxu1 %vm591_vm2, %v3838_v9 }
 0x284   : > { %v5238_v16 = vpop.f32.mrb[32].mxu0 }
 0x285   : > { %v2055_v25 = vpop.f32.mrb[33].mxu0  ;;  %v5636_v32 = vadd.f32 %v5238_v16, %v7163_v30 }
 0x286   : > { %v5638_v39 = vadd.f32 %v7163_v30, %v2055_v25 }
 0x288   : > { %v5241_v29 = vpop.f32.mrb[34].mxu0 }
 0x289   : > { %v2065_v42 = vpop.f32.mrb[35].mxu0  ;;  %v5640_v57 = vadd.f32 %v5241_v29, %v7163_v30 }
 0x28a   : > { %v5642_v0 = vadd.f32 %v7163_v30, %v2065_v42 }
 0x28c   : > { %v5244_v46 = vpop.f32.mrb[36].mxu0 }
 0x28d   : > { %v2075_v58 = vpop.f32.mrb[37].mxu0  ;;  %v5644_v27 = vadd.f32 %v5244_v46, %v7163_v30 }
 0x28e   : > { %v5646_v38 = vadd.f32 %v7163_v30, %v2075_v58 }
 0x290   : > { %v5247_v63 = vpop.f32.mrb[38].mxu0 }
 0x291   : > { %v2085_v48 = vpop.f32.mrb[39].mxu0  ;;  %v5648_v17 = vadd.f32 %v5247_v63, %v7163_v30 }
 0x292   : > { %v5650_v53 = vadd.f32 %v7163_v30, %v2085_v48 }
 0x294   : > { %v5250_v14 = vpop.f32.mrb[40].mxu0 }
 0x295   : > { %v2095_v19 = vpop.f32.mrb[41].mxu0  ;;  %v5652_v34 = vadd.f32 %v5250_v14, %v7163_v30 }
 0x296   : > { %v5654_v51 = vadd.f32 %v7163_v30, %v2095_v19 }
 0x298   : > { %v7116_v62 = vpop.f32.mrb[42].mxu0 }
 0x299   : > { %v7118_v6 = vpop.f32.mrb[43].mxu0  ;;  %v5656_v9 = vadd.f32 %v7116_v62, %v7163_v30 }
 0x29a   : > { %v5658_v16 = vadd.f32 %v7163_v30, %v7118_v6 }
 0x29c   : > { %v7120_v28 = vpop.f32.mrb[44].mxu0 }
 0x29d   : > { %v7122_v24 = vpop.f32.mrb[45].mxu0  ;;  %v5660_v58 = vadd.f32 %v7120_v28, %v7163_v30 }
 0x29e   : > { %v5662_v63 = vadd.f32 %v7163_v30, %v7122_v24 }
 0x2a0   : > { %v7124_v50 = vpop.f32.mrb[46].mxu0 }
 0x2a1   : > { %v7126_v10 = vpop.f32.mrb[47].mxu0  ;;  %v5664_v6 = vadd.f32 %v7124_v50, %v7163_v30 }
 0x2a2   : > { %v5666_v28 = vadd.f32 %v7163_v30, %v7126_v10 }
 0x2a4   : > { %v7128_v36 = vpop.f32.mrb[48].mxu0 }
 0x2a5   : > { %v7130_v12 = vpop.f32.mrb[49].mxu0 }
 0x2a6   : > { %v5670_v50 = vadd.f32 %v7163_v30, %v7130_v12 }
 0x2a8   : > { %v7132_v60 = vpop.f32.mrb[50].mxu0 }
 0x2a9   : > { %v7134_v11 = vpop.f32.mrb[51].mxu0 }
 0x2ac   : > { %v7136_v37 = vpop.f32.mrb[52].mxu0 }
 0x2ad   : > { %v7138_v52 = vpop.f32.mrb[53].mxu0 }
 0x2b0   : > { %v7140_v35 = vpop.f32.mrb[54].mxu0 }
 0x2b1   : > { %v7142_v15 = vpop.f32.mrb[55].mxu0 }
 0x2b4   : > { %v7144_v5 = vpop.f32.mrb[56].mxu0 }
 0x2b5   : > { %v7146_v40 = vpop.f32.mrb[57].mxu0 }
 0x2b8   : > { %v7148_v18 = vpop.f32.mrb[58].mxu0 }
 0x2b9   : > { %v7150_v43 = vpop.f32.mrb[59].mxu0 }
 0x2bc   : > { %v7152_v45 = vpop.f32.mrb[60].mxu0 }
 0x2bd   : > { %v7154_v21 = vpop.f32.mrb[61].mxu0 }
 0x2c0   : > { %v7156_v22 = vpop.f32.mrb[62].mxu0 }
 0x2c1   : > { %v7158_v23 = vpop.f32.mrb[63].mxu0 }
 0x2c9   : > { %v5518_v41 = vpop.f32.mrb[0].mxu1 }
 0x2ca   : > { %v5637_v47 = vadd.f32 %v5636_v32, %v5518_v41  ;;  %v4006_v49 = vpop.f32.mrb[1].mxu1 }
 0x2cb   : > { %v5639_v55 = vadd.f32 %v5638_v39, %v4006_v49 }
 0x2cc   : > { %4199 = vst.msk [vmem:[%s7171_s13 + $0x8] sm:$0xff] %vm4197_vm4, %v5637_v47  ;;  %v5668_v47 = vadd.f32 %v7128_v36, %v7163_v30  ;;  %v5674_v36 = vadd.f32 %v7163_v30, %v7134_v11 }
 0x2cd   : > { %4198 = vst.msk [vmem:[%s7171_s13] sm:$0xff] %vm4197_vm4, %v5639_v55  ;;  %v5521_v2 = vpop.f32.mrb[2].mxu1 }
 0x2ce   : > { %v5641_v8 = vadd.f32 %v5640_v57, %v5521_v2  ;;  %v4016_v13 = vpop.f32.mrb[3].mxu1 }
 0x2cf   : > { %v5643_v20 = vadd.f32 %v5642_v0, %v4016_v13  ;;  %v5672_v0 = vadd.f32 %v7132_v60, %v7163_v30  ;;  %v5678_v60 = vadd.f32 %v7163_v30, %v7138_v52 }
 0x2d0   : > { %4201 = vst.msk [vmem:[%s7171_s13 + $0x18] sm:$0xff] %vm4197_vm4, %v5641_v8 }
 0x2d1   : > { %4200 = vst.msk [vmem:[%s7171_s13 + $0x10] sm:$0xff] %vm4197_vm4, %v5643_v20  ;;  %v5524_v44 = vpop.f32.mrb[4].mxu1  ;;  %v5676_v20 = vadd.f32 %v7136_v37, %v7163_v30  ;;  %v5682_v37 = vadd.f32 %v7163_v30, %v7142_v15 }
 0x2d2   : > { %v5645_v54 = vadd.f32 %v5644_v27, %v5524_v44  ;;  %v4026_v61 = vpop.f32.mrb[5].mxu1 }
 0x2d3   : > { %v5647_v7 = vadd.f32 %v5646_v38, %v4026_v61 }
 0x2d4   : > { %4203 = vst.msk [vmem:[%s7171_s13 + $0x28] sm:$0xff] %vm4197_vm4, %v5645_v54  ;;  %v5680_v54 = vadd.f32 %v7140_v35, %v7163_v30  ;;  %v5686_v35 = vadd.f32 %v7163_v30, %v7146_v40 }
 0x2d5   : > { %4202 = vst.msk [vmem:[%s7171_s13 + $0x20] sm:$0xff] %vm4197_vm4, %v5647_v7  ;;  %v5527_v33 = vpop.f32.mrb[6].mxu1 }
 0x2d6   : > { %v5649_v3 = vadd.f32 %v5648_v17, %v5527_v33  ;;  %v4036_v31 = vpop.f32.mrb[7].mxu1 }
 0x2d7   : > { %v5651_v26 = vadd.f32 %v5650_v53, %v4036_v31  ;;  %v5684_v53 = vadd.f32 %v7144_v5, %v7163_v30  ;;  %v5690_v5 = vadd.f32 %v7163_v30, %v7150_v43 }
 0x2d8   : > { %4205 = vst.msk [vmem:[%s7171_s13 + $0x38] sm:$0xff] %vm4197_vm4, %v5649_v3 }
 0x2d9   : > { %4204 = vst.msk [vmem:[%s7171_s13 + $0x30] sm:$0xff] %vm4197_vm4, %v5651_v26  ;;  %v5530_v56 = vpop.f32.mrb[8].mxu1  ;;  %v5688_v26 = vadd.f32 %v7148_v18, %v7163_v30  ;;  %v5694_v18 = vadd.f32 %v7163_v30, %v7154_v21 }
 0x2da   : > { %v5653_v59 = vadd.f32 %v5652_v34, %v5530_v56  ;;  %v4046_v1 = vpop.f32.mrb[9].mxu1 }
 0x2db   : > { %v5655_v4 = vadd.f32 %v5654_v51, %v4046_v1 }
 0x2dc   : > { %4207 = vst.msk [vmem:[%s7171_s13 + $0x48] sm:$0xff] %vm4197_vm4, %v5653_v59  ;;  %v5692_v59 = vadd.f32 %v7152_v45, %v7163_v30  ;;  %v5698_v45 = vadd.f32 %v7163_v30, %v7158_v23 }
 0x2dd   : > { %4206 = vst.msk [vmem:[%s7171_s13 + $0x40] sm:$0xff] %vm4197_vm4, %v5655_v4  ;;  %v5533_v25 = vpop.f32.mrb[10].mxu1 }
 0x2de   : > { %v5657_v29 = vadd.f32 %v5656_v9, %v5533_v25  ;;  %v4056_v42 = vpop.f32.mrb[11].mxu1 }
 0x2df   : > { %v5659_v46 = vadd.f32 %v5658_v16, %v4056_v42  ;;  %v5696_v16 = vadd.f32 %v7156_v22, %v7163_v30 }
 0x2e0   : > { %4209 = vst.msk [vmem:[%s7171_s13 + $0x58] sm:$0xff] %vm4197_vm4, %v5657_v29 }
 0x2e1   : > { %4208 = vst.msk [vmem:[%s7171_s13 + $0x50] sm:$0xff] %vm4197_vm4, %v5659_v46  ;;  %v5536_v48 = vpop.f32.mrb[12].mxu1 }
 0x2e2   : > { %v5661_v14 = vadd.f32 %v5660_v58, %v5536_v48  ;;  %v4066_v19 = vpop.f32.mrb[13].mxu1 }
 0x2e3   : > { %v5663_v62 = vadd.f32 %v5662_v63, %v4066_v19 }
 0x2e4   : > { %4211 = vst.msk [vmem:[%s7171_s13 + $0x68] sm:$0xff] %vm4197_vm4, %v5661_v14 }
 0x2e5   : > { %4210 = vst.msk [vmem:[%s7171_s13 + $0x60] sm:$0xff] %vm4197_vm4, %v5663_v62  ;;  %v5539_v24 = vpop.f32.mrb[14].mxu1 }
 0x2e6   : > { %v5665_v32 = vadd.f32 %v5664_v6, %v5539_v24  ;;  %v4076_v39 = vpop.f32.mrb[15].mxu1 }
 0x2e7   : > { %v5667_v41 = vadd.f32 %v5666_v28, %v4076_v39 }
 0x2e8   : > { %4213 = vst.msk [vmem:[%s7171_s13 + $0x78] sm:$0xff] %vm4197_vm4, %v5665_v32 }
 0x2e9   : > { %4212 = vst.msk [vmem:[%s7171_s13 + $0x70] sm:$0xff] %vm4197_vm4, %v5667_v41  ;;  %v5542_v10 = vpop.f32.mrb[16].mxu1 }
 0x2ea   : > { %v5669_v49 = vadd.f32 %v5668_v47, %v5542_v10  ;;  %v4086_v55 = vpop.f32.mrb[17].mxu1 }
 0x2eb   : > { %v5671_v57 = vadd.f32 %v5670_v50, %v4086_v55 }
 0x2ec   : > { %4215 = vst.msk [vmem:[%s7171_s13 + $0x88] sm:$0xff] %vm4197_vm4, %v5669_v49 }
 0x2ed   : > { %4214 = vst.msk [vmem:[%s7171_s13 + $0x80] sm:$0xff] %vm4197_vm4, %v5671_v57  ;;  %v5545_v12 = vpop.f32.mrb[18].mxu1 }
 0x2ee   : > { %v5673_v2 = vadd.f32 %v5672_v0, %v5545_v12  ;;  %v4096_v8 = vpop.f32.mrb[19].mxu1 }
 0x2ef   : > { %v5675_v13 = vadd.f32 %v5674_v36, %v4096_v8 }
 0x2f0   : > { %4217 = vst.msk [vmem:[%s7171_s13 + $0x98] sm:$0xff] %vm4197_vm4, %v5673_v2 }
 0x2f1   : > { %4216 = vst.msk [vmem:[%s7171_s13 + $0x90] sm:$0xff] %vm4197_vm4, %v5675_v13  ;;  %v5548_v11 = vpop.f32.mrb[20].mxu1 }
 0x2f2   : > { %v5677_v27 = vadd.f32 %v5676_v20, %v5548_v11  ;;  %v4106_v38 = vpop.f32.mrb[21].mxu1 }
 0x2f3   : > { %v5679_v44 = vadd.f32 %v5678_v60, %v4106_v38 }
 0x2f4   : > { %4219 = vst.msk [vmem:[%s7171_s13 + $0xa8] sm:$0xff] %vm4197_vm4, %v5677_v27 }
 0x2f5   : > { %4218 = vst.msk [vmem:[%s7171_s13 + $0xa0] sm:$0xff] %vm4197_vm4, %v5679_v44  ;;  %v5551_v52 = vpop.f32.mrb[22].mxu1 }
 0x2f6   : > { %v5681_v61 = vadd.f32 %v5680_v54, %v5551_v52  ;;  %v4116_v7 = vpop.f32.mrb[23].mxu1 }
 0x2f7   : > { %v5683_v17 = vadd.f32 %v5682_v37, %v4116_v7 }
 0x2f8   : > { %4221 = vst.msk [vmem:[%s7171_s13 + $0xb8] sm:$0xff] %vm4197_vm4, %v5681_v61 }
 0x2f9   : > { %4220 = vst.msk [vmem:[%s7171_s13 + $0xb0] sm:$0xff] %vm4197_vm4, %v5683_v17  ;;  %v5554_v15 = vpop.f32.mrb[24].mxu1 }
 0x2fa   : > { %v5685_v33 = vadd.f32 %v5684_v53, %v5554_v15  ;;  %v4126_v3 = vpop.f32.mrb[25].mxu1 }
 0x2fb   : > { %v5687_v31 = vadd.f32 %v5686_v35, %v4126_v3 }
 0x2fc   : > { %4223 = vst.msk [vmem:[%s7171_s13 + $0xc8] sm:$0xff] %vm4197_vm4, %v5685_v33 }
 0x2fd   : > { %4222 = vst.msk [vmem:[%s7171_s13 + $0xc0] sm:$0xff] %vm4197_vm4, %v5687_v31  ;;  %v5557_v40 = vpop.f32.mrb[26].mxu1 }
 0x2fe   : > { %v5689_v34 = vadd.f32 %v5688_v26, %v5557_v40  ;;  %v4136_v51 = vpop.f32.mrb[27].mxu1 }
 0x2ff   : > { %v5691_v56 = vadd.f32 %v5690_v5, %v4136_v51 }
 0x300   : > { %4225 = vst.msk [vmem:[%s7171_s13 + $0xd8] sm:$0xff] %vm4197_vm4, %v5689_v34 }
 0x301   : > { %4224 = vst.msk [vmem:[%s7171_s13 + $0xd0] sm:$0xff] %vm4197_vm4, %v5691_v56  ;;  %v5560_v43 = vpop.f32.mrb[28].mxu1 }
 0x302   : > { %v5693_v1 = vadd.f32 %v5692_v59, %v5560_v43  ;;  %v4146_v4 = vpop.f32.mrb[29].mxu1 }
 0x303   : > { %v5695_v9 = vadd.f32 %v5694_v18, %v4146_v4 }
 0x304   : > { %4227 = vst.msk [vmem:[%s7171_s13 + $0xe8] sm:$0xff] %vm4197_vm4, %v5693_v1 }
 0x305   : > { %4226 = vst.msk [vmem:[%s7171_s13 + $0xe0] sm:$0xff] %vm4197_vm4, %v5695_v9  ;;  %v5563_v25 = vpop.f32.mrb[30].mxu1 }
 0x306   : > { %v5697_v29 = vadd.f32 %v5696_v16, %v5563_v25  ;;  %v4156_v42 = vpop.f32.mrb[31].mxu1 }
 0x307   : > { %v5699_v21 = vadd.f32 %v5698_v45, %v4156_v42 }
 0x308   : > { %4229 = vst.msk [vmem:[%s7171_s13 + $0xf8] sm:$0xff] %vm4197_vm4, %v5697_v29 }
 0x309   : > { %4228 = vst.msk [vmem:[%s7171_s13 + $0xf0] sm:$0xff] %vm4197_vm4, %v5699_v21 }
 0x30a PF: > { %s15_s18 = sadd.s32 1, %s5938_s18  }
 0x30b   : > { %p12_p4 = scmp.ge.s32.totalorder %s15_s18, 4  }
 0x30d   :  { %14 = sbr.rel (!%p12_p4) target bundleno = 1 (0x1), region = 80 }

</bundles_post_ra>
